<compile_context>
chip_gen: v5e
topology: v5e:2x2
jax: 0.10.0
libtpu: 0.0.40
codegen_flags: <defaults>
</compile_context>

<pallas_src>
import math
import functools

import jax
import jax.numpy as jnp
from jax.experimental import pallas as pl
from jax.experimental.pallas import tpu as pltpu


VMEM_LIMIT = 48 * 1024 * 1024  # explicit scoped-VMEM budget (safe on v5e/v6e/v7x)
ROW_TILE = 256                 # default row tile for linear / LN+FFN+LN kernels


def _round_up(x, m):
    return ((x + m - 1) // m) * m


# ---------------------------------------------------------------------------
# Row-tiled linear:  y = x @ W + b      (x: (N, Din), W: (Din, Dout), b: (1, Dout))
# Weights/bias stay resident in VMEM (constant index_map); rows are pipelined.
# ---------------------------------------------------------------------------
def _linear_kernel(x_ref, w_ref, b_ref, o_ref):
    y = jnp.dot(x_ref[...], w_ref[...], preferred_element_type=jnp.float32)
    o_ref[...] = (y + b_ref[...]).astype(o_ref.dtype)


def linear(x2d, w, b, *, tm=ROW_TILE):
    N, Din = x2d.shape
    Dout = w.shape[1]
    tm = min(tm, _round_up(N, 8))
    return pl.pallas_call(
        _linear_kernel,
        out_shape=jax.ShapeDtypeStruct((N, Dout), x2d.dtype),
        grid=(pl.cdiv(N, tm),),
        in_specs=[
            pl.BlockSpec((tm, Din), lambda i: (i, 0)),
            pl.BlockSpec((Din, Dout), lambda i: (0, 0)),
            pl.BlockSpec((1, Dout), lambda i: (0, 0)),
        ],
        out_specs=pl.BlockSpec((tm, Dout), lambda i: (i, 0)),
        compiler_params=pltpu.CompilerParams(
            dimension_semantics=("parallel",),
            vmem_limit_bytes=VMEM_LIMIT,
        ),
    )(x2d, w, b.reshape(1, Dout))


# ---------------------------------------------------------------------------
# Attention (all heads of one batch per grid step) + fused output projection.
#   q: (B, H, Sq, hd)   k, v: (B, H, Sk, hd)   wo: (H, hd, D)   bo: (1, D)
#   out: (B, Sq, D)   -- lane-dense, head-merge done implicitly via per-head
#                        projection-and-sum (no transpose / reshape in the kernel).
#   Q is pre-scaled by 1/sqrt(hd) (folded into the QKV projection weights).
# ---------------------------------------------------------------------------
def _attn_kernel(q_ref, k_ref, v_ref, wo_ref, bo_ref, o_ref):
    q = q_ref[0]  # (H, Sq, hd)
    k = k_ref[0]  # (H, Sk, hd)
    v = v_ref[0]  # (H, Sk, hd)

    # scores: (H, Sq, Sk), contracting last dims -> no explicit K transpose.
    s = jax.lax.dot_general(q, k, (((2,), (2,)), ((0,), (0,))),
                            preferred_element_type=jnp.float32)
    s = s - jnp.max(s, axis=-1, keepdims=True)
    p = jnp.exp(s)
    denom = jnp.sum(p, axis=-1, keepdims=True)
    p = p * pl.reciprocal(denom, approx=True)          # EUP reciprocal, VALU multiply

    # per-head attention output: (H, Sq, hd)
    o = jax.lax.dot_general(p, v, (((2,), (1,)), ((0,), (0,))),
                            preferred_element_type=jnp.float32)

    # fused output projection: sum_h o[h] @ Wo[h]  ==  concat_heads(o) @ Wo
    proj = jax.lax.dot_general(o, wo_ref[...], (((2,), (1,)), ((0,), (0,))),
                               preferred_element_type=jnp.float32)  # (H, Sq, D)
    out = jnp.sum(proj, axis=0) + bo_ref[...]                       # (Sq, D)
    o_ref[0] = out.astype(o_ref.dtype)


def attention_projected(q, k, v, wo, bo):
    B, H, Sq, hd = q.shape
    Sk = k.shape[2]
    D = H * hd
    return pl.pallas_call(
        _attn_kernel,
        out_shape=jax.ShapeDtypeStruct((B, Sq, D), q.dtype),
        grid=(B,),
        in_specs=[
            pl.BlockSpec((1, H, Sq, hd), lambda b: (b, 0, 0, 0)),
            pl.BlockSpec((1, H, Sk, hd), lambda b: (b, 0, 0, 0)),
            pl.BlockSpec((1, H, Sk, hd), lambda b: (b, 0, 0, 0)),
            pl.BlockSpec((H, hd, D), lambda b: (0, 0, 0)),
            pl.BlockSpec((1, D), lambda b: (0, 0)),
        ],
        out_specs=pl.BlockSpec((1, Sq, D), lambda b: (b, 0, 0)),
        compiler_params=pltpu.CompilerParams(
            dimension_semantics=("parallel",),
            vmem_limit_bytes=VMEM_LIMIT,
        ),
    )(q, k, v, wo, bo.reshape(1, D))


# ---------------------------------------------------------------------------
# Fused residual + LN1 + FFN + residual + LN2, row-tiled:
#   n1  = LN(x + y) * g1 + b1
#   f   = relu(n1 @ W1 + bb1) @ W2 + bb2
#   out = LN(n1 + f) * g2 + b2
# ---------------------------------------------------------------------------
def _ln_ffn_ln_kernel(x_ref, y_ref, g1_ref, b1_ref, w1_ref, bb1_ref,
                      w2_ref, bb2_ref, g2_ref, b2_ref, o_ref, *, eps):
    z = x_ref[...] + y_ref[...]
    mean = jnp.mean(z, axis=-1, keepdims=True)
    var = jnp.mean((z - mean) ** 2, axis=-1, keepdims=True)
    n1 = (z - mean) * jax.lax.rsqrt(var + eps) * g1_ref[...] + b1_ref[...]

    h = jnp.dot(n1, w1_ref[...], preferred_element_type=jnp.float32) + bb1_ref[...]
    h = jnp.maximum(h, 0.0)
    f = jnp.dot(h, w2_ref[...], preferred_element_type=jnp.float32) + bb2_ref[...]

    z2 = n1 + f
    mean2 = jnp.mean(z2, axis=-1, keepdims=True)
    var2 = jnp.mean((z2 - mean2) ** 2, axis=-1, keepdims=True)
    out = (z2 - mean2) * jax.lax.rsqrt(var2 + eps) * g2_ref[...] + b2_ref[...]
    o_ref[...] = out.astype(o_ref.dtype)


def ln_ffn_ln(x2d, y2d, g1, b1, w1, bb1, w2, bb2, g2, b2, *, eps=1e-5, tm=ROW_TILE):
    N, D = x2d.shape
    Dff = w1.shape[1]
    tm = min(tm, _round_up(N, 8))
    kernel = functools.partial(_ln_ffn_ln_kernel, eps=eps)
    return pl.pallas_call(
        kernel,
        out_shape=jax.ShapeDtypeStruct((N, D), x2d.dtype),
        grid=(pl.cdiv(N, tm),),
        in_specs=[
            pl.BlockSpec((tm, D), lambda i: (i, 0)),
            pl.BlockSpec((tm, D), lambda i: (i, 0)),
            pl.BlockSpec((1, D), lambda i: (0, 0)),
            pl.BlockSpec((1, D), lambda i: (0, 0)),
            pl.BlockSpec((D, Dff), lambda i: (0, 0)),
            pl.BlockSpec((1, Dff), lambda i: (0, 0)),
            pl.BlockSpec((Dff, D), lambda i: (0, 0)),
            pl.BlockSpec((1, D), lambda i: (0, 0)),
            pl.BlockSpec((1, D), lambda i: (0, 0)),
            pl.BlockSpec((1, D), lambda i: (0, 0)),
        ],
        out_specs=pl.BlockSpec((tm, D), lambda i: (i, 0)),
        compiler_params=pltpu.CompilerParams(
            dimension_semantics=("parallel",),
            vmem_limit_bytes=VMEM_LIMIT,
        ),
    )(x2d, y2d, g1.reshape(1, D), b1.reshape(1, D), w1, bb1.reshape(1, Dff),
      w2, bb2.reshape(1, D), g2.reshape(1, D), b2.reshape(1, D))


# ---------------------------------------------------------------------------
# Parameter init (deterministic, mirrors nn.Linear's U(-1/sqrt(fan_in), ..) init)
# ---------------------------------------------------------------------------
def init_params(key, d_model, num_heads):
    d_ff = d_model * 4

    def lin(k, din, dout):
        k1, k2 = jax.random.split(k)
        bound = 1.0 / math.sqrt(din)
        w = jax.random.uniform(k1, (din, dout), jnp.float32, -bound, bound)
        b = jax.random.uniform(k2, (dout,), jnp.float32, -bound, bound)
        return w, b

    keys = iter(jax.random.split(key, 16))
    params = {}
    for name in ["c2g_query", "c2g_key", "c2g_value",
                 "g2c_query", "g2c_key", "g2c_value",
                 "c2g_out", "g2c_out"]:
        w, b = lin(next(keys), d_model, d_model)
        params[name + "_w"], params[name + "_b"] = w, b
    for name in ["code_ffn", "graph_ffn"]:
        w1, b1 = lin(next(keys), d_model, d_ff)
        w2, b2 = lin(next(keys), d_ff, d_model)
        params[name + "_w1"], params[name + "_b1"] = w1, b1
        params[name + "_w2"], params[name + "_b2"] = w2, b2
    for name in ["code_norm1", "code_norm2", "graph_norm1", "graph_norm2"]:
        params[name + "_g"] = jnp.ones((d_model,), jnp.float32)
        params[name + "_b"] = jnp.zeros((d_model,), jnp.float32)
    return params


# ---------------------------------------------------------------------------
# Forward pass
# ---------------------------------------------------------------------------
def cross_attention_forward(params, code_emb, graph_emb, num_heads):
    B, Sc, D = code_emb.shape
    Sg = graph_emb.shape[1]
    if Sg == 0:
        return code_emb, graph_emb
    H = num_heads
    hd = D // H
    scale = 1.0 / math.sqrt(hd)

    code2d = code_emb.reshape(B * Sc, D)
    graph2d = graph_emb.reshape(B * Sg, D)

    # Fused QKV projections: one (D, 3D) matmul per stream.
    # code stream supplies Q for c2g and K/V for g2c (and vice versa for graph).
    # The attention scale is folded into the query weights/bias.
    w_code = jnp.concatenate([params["c2g_query_w"] * scale,
                              params["g2c_key_w"],
                              params["g2c_value_w"]], axis=1)
    b_code = jnp.concatenate([params["c2g_query_b"] * scale,
                              params["g2c_key_b"],
                              params["g2c_value_b"]], axis=0)
    w_graph = jnp.concatenate([params["g2c_query_w"] * scale,
                               params["c2g_key_w"],
                               params["c2g_value_w"]], axis=1)
    b_graph = jnp.concatenate([params["g2c_query_b"] * scale,
                               params["c2g_key_b"],
                               params["c2g_value_b"]], axis=0)

    code_qkv = linear(code2d, w_code, b_code)      # (B*Sc, 3D)
    graph_qkv = linear(graph2d, w_graph, b_graph)  # (B*Sg, 3D)

    def split_heads(x2d, S):
        return x2d.reshape(B, S, H, hd).transpose(0, 2, 1, 3)

    q_c = split_heads(code_qkv[:, :D], Sc)          # c2g query (pre-scaled)
    k_c = split_heads(code_qkv[:, D:2 * D], Sc)     # g2c key
    v_c = split_heads(code_qkv[:, 2 * D:], Sc)      # g2c value
    q_g = split_heads(graph_qkv[:, :D], Sg)         # g2c query (pre-scaled)
    k_g = split_heads(graph_qkv[:, D:2 * D], Sg)    # c2g key
    v_g = split_heads(graph_qkv[:, 2 * D:], Sg)     # c2g value

    wo_c2g = params["c2g_out_w"].reshape(H, hd, D)
    wo_g2c = params["g2c_out_w"].reshape(H, hd, D)

    # Attention + fused output projection -> lane-dense (B, S, D).
    out_c2g = attention_projected(q_c, k_g, v_g, wo_c2g, params["c2g_out_b"])
    out_g2c = attention_projected(q_g, k_c, v_c, wo_g2c, params["g2c_out_b"])

    code_out = ln_ffn_ln(
        code2d, out_c2g.reshape(B * Sc, D),
        params["code_norm1_g"], params["code_norm1_b"],
        params["code_ffn_w1"], params["code_ffn_b1"],
        params["code_ffn_w2"], params["code_ffn_b2"],
        params["code_norm2_g"], params["code_norm2_b"])
    graph_out = ln_ffn_ln(
        graph2d, out_g2c.reshape(B * Sg, D),
        params["graph_norm1_g"], params["graph_norm1_b"],
        params["graph_ffn_w1"], params["graph_ffn_b1"],
        params["graph_ffn_w2"], params["graph_ffn_b2"],
        params["graph_norm2_g"], params["graph_norm2_b"])

    return code_out.reshape(B, Sc, D), graph_out.reshape(B, Sg, D)


# ---------------------------------------------------------------------------
# Pure-JAX reference (mirrors the PyTorch forward semantics)
# ---------------------------------------------------------------------------
def reference_forward(params, code_emb, graph_emb, num_heads):
    B, Sc, D = code_emb.shape
    Sg = graph_emb.shape[1]
    H = num_heads
    hd = D // H

    def lin(x, name):
        return x @ params[name + "_w"] + params[name + "_b"]

    def split_heads(x, S):
        return x.reshape(B, S, H, hd).transpose(0, 2, 1, 3)

    def ln(x, name):
        m = jnp.mean(x, axis=-1, keepdims=True)
        v = jnp.mean((x - m) ** 2, axis=-1, keepdims=True)
        return (x - m) / jnp.sqrt(v + 1e-5) * params[name + "_g"] + params[name + "_b"]

    def ffn_ref(x, name):
        h = jnp.maximum(x @ params[name + "_w1"] + params[name + "_b1"], 0.0)
        return h @ params[name + "_w2"] + params[name + "_b2"]

    q_c = split_heads(lin(code_emb, "c2g_query"), Sc)
    k_g = split_heads(lin(graph_emb, "c2g_key"), Sg)
    v_g = split_heads(lin(graph_emb, "c2g_value"), Sg)
    q_g = split_heads(lin(graph_emb, "g2c_query"), Sg)
    k_c = split_heads(lin(code_emb, "g2c_key"), Sc)
    v_c = split_heads(lin(code_emb, "g2c_value"), Sc)

    def attn(q, k, v):
        s = jnp.einsum("bhqd,bhkd->bhqk", q, k) / math.sqrt(hd)
        p = jax.nn.softmax(s, axis=-1)
        return jnp.einsum("bhqk,bhkd->bhqd", p, v)

    o_c2g = attn(q_c, k_g, v_g).transpose(0, 2, 1, 3).reshape(B, Sc, D)
    o_c2g = lin(o_c2g, "c2g_out")
    o_g2c = attn(q_g, k_c, v_c).transpose(0, 2, 1, 3).reshape(B, Sg, D)
    o_g2c = lin(o_g2c, "g2c_out")

    code_norm = ln(code_emb + o_c2g, "code_norm1")
    code_out = ln(code_norm + ffn_ref(code_norm, "code_ffn"), "code_norm2")
    graph_norm = ln(graph_emb + o_g2c, "graph_norm1")
    graph_out = ln(graph_norm + ffn_ref(graph_norm, "graph_ffn"), "graph_norm2")
    return code_out, graph_out


if __name__ == "__main__":
    d_model, num_heads = 32, 4
    B, Sc, Sg = 2, 8, 16

    key = jax.random.PRNGKey(0)
    kp, kc, kg = jax.random.split(key, 3)
    params = init_params(kp, d_model, num_heads)
    code_emb = jax.random.normal(kc, (B, Sc, d_model), jnp.float32)
    graph_emb = jax.random.normal(kg, (B, Sg, d_model), jnp.float32)

    fwd = jax.jit(cross_attention_forward, static_argnums=3)
    code_out, graph_out = fwd(params, code_emb, graph_emb, num_heads)
    code_out = jax.block_until_ready(code_out)
    graph_out = jax.block_until_ready(graph_out)

    # Sanity check against pure-JAX reference (tolerance loosened slightly for the
    # EUP approximate-reciprocal softmax normalization).
    code_ref, graph_ref = reference_forward(params, code_emb, graph_emb, num_heads)
    assert code_out.shape == (B, Sc, d_model) and graph_out.shape == (B, Sg, d_model)
    assert jnp.allclose(code_out, code_ref, rtol=2e-2, atol=2e-2)
    assert jnp.allclose(graph_out, graph_ref, rtol=2e-2, atol=2e-2)

    print("KERNEL_OK")
</pallas_src>

<mosaic_0001>
module attributes {stable_mosaic.version = 11 : i64} {
  func.func @_linear_kernel(%arg0: i32, %arg1: memref<32x32xf32, #tpu.memory_space<vmem>>, %arg2: memref<32x96xf32, #tpu.memory_space<vmem>>, %arg3: memref<1x96xf32, #tpu.memory_space<vmem>>, %arg4: memref<32x96xf32, #tpu.memory_space<vmem>>) attributes {dimension_semantics = [#tpu.dimension_semantics<parallel>], iteration_bounds = array<i64: 1>, scalar_prefetch = 0 : i64, scratch_operands = 0 : i64, tpu.core_type = #tpu.core_type<tc>, window_params = [{transform_indices = @transform_0, window_bounds = array<i64: 32, 32>}, {pipeline_mode = #tpu.pipeline_mode<synchronous>, transform_indices = @transform_1, window_bounds = array<i64: 32, 96>}, {pipeline_mode = #tpu.pipeline_mode<synchronous>, transform_indices = @transform_2, window_bounds = array<i64: 1, 96>}, {transform_indices = @transform_3, window_bounds = array<i64: 32, 96>}]} {
    %c0 = arith.constant 0 : index
    %c0_0 = arith.constant 0 : index
    %0 = vector.load %arg1[%c0, %c0_0] : memref<32x32xf32, #tpu.memory_space<vmem>>, vector<32x32xf32>
    %c0_1 = arith.constant 0 : index
    %c0_2 = arith.constant 0 : index
    %1 = vector.load %arg2[%c0_1, %c0_2] : memref<32x96xf32, #tpu.memory_space<vmem>>, vector<32x96xf32>
    %cst = arith.constant dense<0.000000e+00> : vector<32x96xf32>
    %2 = tpu.matmul %0, %1, %cst {dimension_numbers = #tpu.dot_dimension_numbers<[1], [0], [0], [1], [0, 0, 1, 1], [], []>} : vector<32x32xf32>, vector<32x96xf32>, vector<32x96xf32> -> vector<32x96xf32>
    %c0_3 = arith.constant 0 : index
    %c0_4 = arith.constant 0 : index
    %3 = vector.load %arg3[%c0_3, %c0_4] : memref<1x96xf32, #tpu.memory_space<vmem>>, vector<1x96xf32>
    %4 = vector.broadcast %3 : vector<1x96xf32> to vector<32x96xf32>
    %5 = arith.addf %2, %4 : vector<32x96xf32>
    %c0_5 = arith.constant 0 : index
    %c0_6 = arith.constant 0 : index
    %6 = vector.load %arg4[%c0_5, %c0_6] : memref<32x96xf32, #tpu.memory_space<vmem>>, vector<32x96xf32>
    tpu.vector_store %arg4[%c0_5, %c0_6], %5 {strides = array<i32>} : memref<32x96xf32, #tpu.memory_space<vmem>>, vector<32x96xf32>,
    return
  }
  func.func @transform_0(%arg0: i32) -> (i32, i32) {
    %c0_i32 = arith.constant 0 : i32
    %c0_i32_0 = arith.constant 0 : i32
    return %arg0, %c0_i32 : i32, i32
  }
  func.func @transform_1(%arg0: i32) -> (i32, i32) {
    %c0_i32 = arith.constant 0 : i32
    %c0_i32_0 = arith.constant 0 : i32
    %c0_i32_1 = arith.constant 0 : i32
    return %c0_i32, %c0_i32_0 : i32, i32
  }
  func.func @transform_2(%arg0: i32) -> (i32, i32) {
    %c0_i32 = arith.constant 0 : i32
    %c0_i32_0 = arith.constant 0 : i32
    %c0_i32_1 = arith.constant 0 : i32
    return %c0_i32, %c0_i32_0 : i32, i32
  }
  func.func @transform_3(%arg0: i32) -> (i32, i32) {
    %c0_i32 = arith.constant 0 : i32
    %c0_i32_0 = arith.constant 0 : i32
    return %arg0, %c0_i32 : i32, i32
  }
}

module attributes {stable_mosaic.version = 11 : i64} {
  func.func @_linear_kernel(%arg0: i32, %arg1: memref<16x32xf32, #tpu.memory_space<vmem>>, %arg2: memref<32x96xf32, #tpu.memory_space<vmem>>, %arg3: memref<1x96xf32, #tpu.memory_space<vmem>>, %arg4: memref<16x96xf32, #tpu.memory_space<vmem>>) attributes {dimension_semantics = [#tpu.dimension_semantics<parallel>], iteration_bounds = array<i64: 1>, scalar_prefetch = 0 : i64, scratch_operands = 0 : i64, tpu.core_type = #tpu.core_type<tc>, window_params = [{transform_indices = @transform_0, window_bounds = array<i64: 16, 32>}, {pipeline_mode = #tpu.pipeline_mode<synchronous>, transform_indices = @transform_1, window_bounds = array<i64: 32, 96>}, {pipeline_mode = #tpu.pipeline_mode<synchronous>, transform_indices = @transform_2, window_bounds = array<i64: 1, 96>}, {transform_indices = @transform_3, window_bounds = array<i64: 16, 96>}]} {
    %c0 = arith.constant 0 : index
    %c0_0 = arith.constant 0 : index
    %0 = vector.load %arg1[%c0, %c0_0] : memref<16x32xf32, #tpu.memory_space<vmem>>, vector<16x32xf32>
    %c0_1 = arith.constant 0 : index
    %c0_2 = arith.constant 0 : index
    %1 = vector.load %arg2[%c0_1, %c0_2] : memref<32x96xf32, #tpu.memory_space<vmem>>, vector<32x96xf32>
    %cst = arith.constant dense<0.000000e+00> : vector<16x96xf32>
    %2 = tpu.matmul %0, %1, %cst {dimension_numbers = #tpu.dot_dimension_numbers<[1], [0], [0], [1], [0, 0, 1, 1], [], []>} : vector<16x32xf32>, vector<32x96xf32>, vector<16x96xf32> -> vector<16x96xf32>
    %c0_3 = arith.constant 0 : index
    %c0_4 = arith.constant 0 : index
    %3 = vector.load %arg3[%c0_3, %c0_4] : memref<1x96xf32, #tpu.memory_space<vmem>>, vector<1x96xf32>
    %4 = vector.broadcast %3 : vector<1x96xf32> to vector<16x96xf32>
    %5 = arith.addf %2, %4 : vector<16x96xf32>
    %c0_5 = arith.constant 0 : index
    %c0_6 = arith.constant 0 : index
    %6 = vector.load %arg4[%c0_5, %c0_6] : memref<16x96xf32, #tpu.memory_space<vmem>>, vector<16x96xf32>
    tpu.vector_store %arg4[%c0_5, %c0_6], %5 {strides = array<i32>} : memref<16x96xf32, #tpu.memory_space<vmem>>, vector<16x96xf32>,
    return
  }
  func.func @transform_0(%arg0: i32) -> (i32, i32) {
    %c0_i32 = arith.constant 0 : i32
    %c0_i32_0 = arith.constant 0 : i32
    return %arg0, %c0_i32 : i32, i32
  }
  func.func @transform_1(%arg0: i32) -> (i32, i32) {
    %c0_i32 = arith.constant 0 : i32
    %c0_i32_0 = arith.constant 0 : i32
    %c0_i32_1 = arith.constant 0 : i32
    return %c0_i32, %c0_i32_0 : i32, i32
  }
  func.func @transform_2(%arg0: i32) -> (i32, i32) {
    %c0_i32 = arith.constant 0 : i32
    %c0_i32_0 = arith.constant 0 : i32
    %c0_i32_1 = arith.constant 0 : i32
    return %c0_i32, %c0_i32_0 : i32, i32
  }
  func.func @transform_3(%arg0: i32) -> (i32, i32) {
    %c0_i32 = arith.constant 0 : i32
    %c0_i32_0 = arith.constant 0 : i32
    return %arg0, %c0_i32 : i32, i32
  }
}

module attributes {stable_mosaic.version = 11 : i64} {
  func.func @_attn_kernel(%arg0: i32, %arg1: memref<1x4x16x8xf32, #tpu.memory_space<vmem>>, %arg2: memref<1x4x8x8xf32, #tpu.memory_space<vmem>>, %arg3: memref<1x4x8x8xf32, #tpu.memory_space<vmem>>, %arg4: memref<4x8x32xf32, #tpu.memory_space<vmem>>, %arg5: memref<1x32xf32, #tpu.memory_space<vmem>>, %arg6: memref<1x16x32xf32, #tpu.memory_space<vmem>>) attributes {dimension_semantics = [#tpu.dimension_semantics<parallel>], iteration_bounds = array<i64: 2>, scalar_prefetch = 0 : i64, scratch_operands = 0 : i64, tpu.core_type = #tpu.core_type<tc>, window_params = [{transform_indices = @transform_0, window_bounds = array<i64: 1, 4, 16, 8>}, {transform_indices = @transform_1, window_bounds = array<i64: 1, 4, 8, 8>}, {transform_indices = @transform_2, window_bounds = array<i64: 1, 4, 8, 8>}, {pipeline_mode = #tpu.pipeline_mode<synchronous>, transform_indices = @transform_3, window_bounds = array<i64: 4, 8, 32>}, {pipeline_mode = #tpu.pipeline_mode<synchronous>, transform_indices = @transform_4, window_bounds = array<i64: 1, 32>}, {transform_indices = @transform_5, window_bounds = array<i64: 1, 16, 32>}]} {
    %c0 = arith.constant 0 : index
    %c0_0 = arith.constant 0 : index
    %c0_1 = arith.constant 0 : index
    %c0_2 = arith.constant 0 : index
    %0 = vector.load %arg1[%c0, %c0_0, %c0_1, %c0_2] : memref<1x4x16x8xf32, #tpu.memory_space<vmem>>, vector<1x4x16x8xf32>
    %1 = vector.shape_cast %0 : vector<1x4x16x8xf32> to vector<4x16x8xf32>
    %c0_3 = arith.constant 0 : index
    %c0_4 = arith.constant 0 : index
    %c0_5 = arith.constant 0 : index
    %c0_6 = arith.constant 0 : index
    %2 = vector.load %arg2[%c0_3, %c0_4, %c0_5, %c0_6] : memref<1x4x8x8xf32, #tpu.memory_space<vmem>>, vector<1x4x8x8xf32>
    %3 = vector.shape_cast %2 : vector<1x4x8x8xf32> to vector<4x8x8xf32>
    %c0_7 = arith.constant 0 : index
    %c0_8 = arith.constant 0 : index
    %c0_9 = arith.constant 0 : index
    %c0_10 = arith.constant 0 : index
    %4 = vector.load %arg3[%c0_7, %c0_8, %c0_9, %c0_10] : memref<1x4x8x8xf32, #tpu.memory_space<vmem>>, vector<1x4x8x8xf32>
    %5 = vector.shape_cast %4 : vector<1x4x8x8xf32> to vector<4x8x8xf32>
    %cst = arith.constant dense<0.000000e+00> : vector<4x16x8xf32>
    %6 = tpu.matmul %1, %3, %cst {dimension_numbers = #tpu.dot_dimension_numbers<[2], [2], [1], [1], [0, 0, 0, 1, 1, 1], [0], [0]>} : vector<4x16x8xf32>, vector<4x8x8xf32>, vector<4x16x8xf32> -> vector<4x16x8xf32>
    %cst_11 = arith.constant dense<0xFF800000> : vector<4x16xf32>
    %7 = vector.multi_reduction <maximumf>, %6, %cst_11 [2] : vector<4x16x8xf32> to vector<4x16xf32>
    %8 = vector.shape_cast %7 : vector<4x16xf32> to vector<4x16x1xf32>
    %9 = vector.broadcast %8 : vector<4x16x1xf32> to vector<4x16x8xf32>
    %10 = arith.subf %6, %9 : vector<4x16x8xf32>
    %11 = math.exp %10 : vector<4x16x8xf32>
    %cst_12 = arith.constant dense<0.000000e+00> : vector<4x16xf32>
    %12 = vector.multi_reduction <add>, %11, %cst_12 [2] : vector<4x16x8xf32> to vector<4x16xf32>
    %13 = vector.shape_cast %12 : vector<4x16xf32> to vector<4x16x1xf32>
    %14 = tpu.reciprocal %13 {approx = true} : vector<4x16x1xf32> -> vector<4x16x1xf32>
    %15 = vector.broadcast %14 : vector<4x16x1xf32> to vector<4x16x8xf32>
    %16 = arith.mulf %11, %15 : vector<4x16x8xf32>
    %cst_13 = arith.constant dense<0.000000e+00> : vector<4x16x8xf32>
    %17 = tpu.matmul %16, %5, %cst_13 {dimension_numbers = #tpu.dot_dimension_numbers<[2], [1], [1], [2], [0, 0, 0, 1, 1, 2], [0], [0]>} : vector<4x16x8xf32>, vector<4x8x8xf32>, vector<4x16x8xf32> -> vector<4x16x8xf32>
    %c0_14 = arith.constant 0 : index
    %c0_15 = arith.constant 0 : index
    %c0_16 = arith.constant 0 : index
    %18 = vector.load %arg4[%c0_14, %c0_15, %c0_16] : memref<4x8x32xf32, #tpu.memory_space<vmem>>, vector<4x8x32xf32>
    %cst_17 = arith.constant dense<0.000000e+00> : vector<4x16x32xf32>
    %19 = tpu.matmul %17, %18, %cst_17 {dimension_numbers = #tpu.dot_dimension_numbers<[2], [1], [1], [2], [0, 0, 0, 1, 1, 2], [0], [0]>} : vector<4x16x8xf32>, vector<4x8x32xf32>, vector<4x16x32xf32> -> vector<4x16x32xf32>
    %cst_18 = arith.constant dense<0.000000e+00> : vector<16x32xf32>
    %20 = vector.multi_reduction <add>, %19, %cst_18 [0] : vector<4x16x32xf32> to vector<16x32xf32>
    %c0_19 = arith.constant 0 : index
    %c0_20 = arith.constant 0 : index
    %21 = vector.load %arg5[%c0_19, %c0_20] : memref<1x32xf32, #tpu.memory_space<vmem>>, vector<1x32xf32>
    %22 = vector.broadcast %21 : vector<1x32xf32> to vector<16x32xf32>
    %23 = arith.addf %20, %22 : vector<16x32xf32>
    %c0_21 = arith.constant 0 : index
    %c0_22 = arith.constant 0 : index
    %c0_23 = arith.constant 0 : index
    %24 = vector.load %arg6[%c0_21, %c0_22, %c0_23] : memref<1x16x32xf32, #tpu.memory_space<vmem>>, vector<1x16x32xf32>
    %25 = vector.shape_cast %24 : vector<1x16x32xf32> to vector<16x32xf32>
    %26 = vector.shape_cast %23 : vector<16x32xf32> to vector<1x16x32xf32>
    tpu.vector_store %arg6[%c0_21, %c0_22, %c0_23], %26 {strides = array<i32>} : memref<1x16x32xf32, #tpu.memory_space<vmem>>, vector<1x16x32xf32>,
    return
  }
  func.func @transform_0(%arg0: i32) -> (i32, i32, i32, i32) {
    %c0_i32 = arith.constant 0 : i32
    %c0_i32_0 = arith.constant 0 : i32
    %c0_i32_1 = arith.constant 0 : i32
    %c0_i32_2 = arith.constant 0 : i32
    return %arg0, %c0_i32, %c0_i32_0, %c0_i32_1 : i32, i32, i32, i32
  }
  func.func @transform_1(%arg0: i32) -> (i32, i32, i32, i32) {
    %c0_i32 = arith.constant 0 : i32
    %c0_i32_0 = arith.constant 0 : i32
    %c0_i32_1 = arith.constant 0 : i32
    %c0_i32_2 = arith.constant 0 : i32
    return %arg0, %c0_i32, %c0_i32_0, %c0_i32_1 : i32, i32, i32, i32
  }
  func.func @transform_2(%arg0: i32) -> (i32, i32, i32, i32) {
    %c0_i32 = arith.constant 0 : i32
    %c0_i32_0 = arith.constant 0 : i32
    %c0_i32_1 = arith.constant 0 : i32
    %c0_i32_2 = arith.constant 0 : i32
    return %arg0, %c0_i32, %c0_i32_0, %c0_i32_1 : i32, i32, i32, i32
  }
  func.func @transform_3(%arg0: i32) -> (i32, i32, i32) {
    %c0_i32 = arith.constant 0 : i32
    %c0_i32_0 = arith.constant 0 : i32
    %c0_i32_1 = arith.constant 0 : i32
    %c0_i32_2 = arith.constant 0 : i32
    return %c0_i32, %c0_i32_0, %c0_i32_1 : i32, i32, i32
  }
  func.func @transform_4(%arg0: i32) -> (i32, i32) {
    %c0_i32 = arith.constant 0 : i32
    %c0_i32_0 = arith.constant 0 : i32
    %c0_i32_1 = arith.constant 0 : i32
    return %c0_i32, %c0_i32_0 : i32, i32
  }
  func.func @transform_5(%arg0: i32) -> (i32, i32, i32) {
    %c0_i32 = arith.constant 0 : i32
    %c0_i32_0 = arith.constant 0 : i32
    %c0_i32_1 = arith.constant 0 : i32
    return %arg0, %c0_i32, %c0_i32_0 : i32, i32, i32
  }
}

module attributes {stable_mosaic.version = 11 : i64} {
  func.func @_ln_ffn_ln_kernel(%arg0: i32, %arg1: memref<32x32xf32, #tpu.memory_space<vmem>>, %arg2: memref<32x32xf32, #tpu.memory_space<vmem>>, %arg3: memref<1x32xf32, #tpu.memory_space<vmem>>, %arg4: memref<1x32xf32, #tpu.memory_space<vmem>>, %arg5: memref<32x128xf32, #tpu.memory_space<vmem>>, %arg6: memref<1x128xf32, #tpu.memory_space<vmem>>, %arg7: memref<128x32xf32, #tpu.memory_space<vmem>>, %arg8: memref<1x32xf32, #tpu.memory_space<vmem>>, %arg9: memref<1x32xf32, #tpu.memory_space<vmem>>, %arg10: memref<1x32xf32, #tpu.memory_space<vmem>>, %arg11: memref<32x32xf32, #tpu.memory_space<vmem>>) attributes {dimension_semantics = [#tpu.dimension_semantics<parallel>], iteration_bounds = array<i64: 1>, scalar_prefetch = 0 : i64, scratch_operands = 0 : i64, tpu.core_type = #tpu.core_type<tc>, window_params = [{transform_indices = @transform_0, window_bounds = array<i64: 32, 32>}, {transform_indices = @transform_1, window_bounds = array<i64: 32, 32>}, {pipeline_mode = #tpu.pipeline_mode<synchronous>, transform_indices = @transform_2, window_bounds = array<i64: 1, 32>}, {pipeline_mode = #tpu.pipeline_mode<synchronous>, transform_indices = @transform_3, window_bounds = array<i64: 1, 32>}, {pipeline_mode = #tpu.pipeline_mode<synchronous>, transform_indices = @transform_4, window_bounds = array<i64: 32, 128>}, {pipeline_mode = #tpu.pipeline_mode<synchronous>, transform_indices = @transform_5, window_bounds = array<i64: 1, 128>}, {pipeline_mode = #tpu.pipeline_mode<synchronous>, transform_indices = @transform_6, window_bounds = array<i64: 128, 32>}, {pipeline_mode = #tpu.pipeline_mode<synchronous>, transform_indices = @transform_7, window_bounds = array<i64: 1, 32>}, {pipeline_mode = #tpu.pipeline_mode<synchronous>, transform_indices = @transform_8, window_bounds = array<i64: 1, 32>}, {pipeline_mode = #tpu.pipeline_mode<synchronous>, transform_indices = @transform_9, window_bounds = array<i64: 1, 32>}, {transform_indices = @transform_10, window_bounds = array<i64: 32, 32>}]} {
    %c0 = arith.constant 0 : index
    %c0_0 = arith.constant 0 : index
    %0 = vector.load %arg1[%c0, %c0_0] : memref<32x32xf32, #tpu.memory_space<vmem>>, vector<32x32xf32>
    %c0_1 = arith.constant 0 : index
    %c0_2 = arith.constant 0 : index
    %1 = vector.load %arg2[%c0_1, %c0_2] : memref<32x32xf32, #tpu.memory_space<vmem>>, vector<32x32xf32>
    %2 = arith.addf %0, %1 : vector<32x32xf32>
    %cst = arith.constant dense<0.000000e+00> : vector<32xf32>
    %3 = vector.multi_reduction <add>, %2, %cst [1] : vector<32x32xf32> to vector<32xf32>
    %4 = vector.shape_cast %3 : vector<32xf32> to vector<32x1xf32>
    %cst_3 = arith.constant 3.200000e+01 : f32
    %5 = vector.broadcast %cst_3 : f32 to vector<32x1xf32>
    %6 = arith.divf %4, %5 : vector<32x1xf32>
    %7 = vector.broadcast %6 : vector<32x1xf32> to vector<32x32xf32>
    %8 = arith.subf %2, %7 : vector<32x32xf32>
    %9 = arith.mulf %8, %8 : vector<32x32xf32>
    %cst_4 = arith.constant dense<0.000000e+00> : vector<32xf32>
    %10 = vector.multi_reduction <add>, %9, %cst_4 [1] : vector<32x32xf32> to vector<32xf32>
    %11 = vector.shape_cast %10 : vector<32xf32> to vector<32x1xf32>
    %cst_5 = arith.constant 3.200000e+01 : f32
    %12 = vector.broadcast %cst_5 : f32 to vector<32x1xf32>
    %13 = arith.divf %11, %12 : vector<32x1xf32>
    %14 = vector.broadcast %6 : vector<32x1xf32> to vector<32x32xf32>
    %15 = arith.subf %2, %14 : vector<32x32xf32>
    %cst_6 = arith.constant 9.99999974E-6 : f32
    %16 = vector.broadcast %cst_6 : f32 to vector<32x1xf32>
    %17 = arith.addf %13, %16 : vector<32x1xf32>
    %18 = math.rsqrt %17 : vector<32x1xf32>
    %19 = vector.broadcast %18 : vector<32x1xf32> to vector<32x32xf32>
    %20 = arith.mulf %15, %19 : vector<32x32xf32>
    %c0_7 = arith.constant 0 : index
    %c0_8 = arith.constant 0 : index
    %21 = vector.load %arg3[%c0_7, %c0_8] : memref<1x32xf32, #tpu.memory_space<vmem>>, vector<1x32xf32>
    %22 = vector.broadcast %21 : vector<1x32xf32> to vector<32x32xf32>
    %23 = arith.mulf %20, %22 : vector<32x32xf32>
    %c0_9 = arith.constant 0 : index
    %c0_10 = arith.constant 0 : index
    %24 = vector.load %arg4[%c0_9, %c0_10] : memref<1x32xf32, #tpu.memory_space<vmem>>, vector<1x32xf32>
    %25 = vector.broadcast %24 : vector<1x32xf32> to vector<32x32xf32>
    %26 = arith.addf %23, %25 : vector<32x32xf32>
    %c0_11 = arith.constant 0 : index
    %c0_12 = arith.constant 0 : index
    %27 = vector.load %arg5[%c0_11, %c0_12] : memref<32x128xf32, #tpu.memory_space<vmem>>, vector<32x128xf32>
    %cst_13 = arith.constant dense<0.000000e+00> : vector<32x128xf32>
    %28 = tpu.matmul %26, %27, %cst_13 {dimension_numbers = #tpu.dot_dimension_numbers<[1], [0], [0], [1], [0, 0, 1, 1], [], []>} : vector<32x32xf32>, vector<32x128xf32>, vector<32x128xf32> -> vector<32x128xf32>
    %c0_14 = arith.constant 0 : index
    %c0_15 = arith.constant 0 : index
    %29 = vector.load %arg6[%c0_14, %c0_15] : memref<1x128xf32, #tpu.memory_space<vmem>>, vector<1x128xf32>
    %30 = vector.broadcast %29 : vector<1x128xf32> to vector<32x128xf32>
    %31 = arith.addf %28, %30 : vector<32x128xf32>
    %cst_16 = arith.constant 0.000000e+00 : f32
    %32 = vector.broadcast %cst_16 : f32 to vector<32x128xf32>
    %33 = arith.maximumf %31, %32 : vector<32x128xf32>
    %c0_17 = arith.constant 0 : index
    %c0_18 = arith.constant 0 : index
    %34 = vector.load %arg7[%c0_17, %c0_18] : memref<128x32xf32, #tpu.memory_space<vmem>>, vector<128x32xf32>
    %cst_19 = arith.constant dense<0.000000e+00> : vector<32x32xf32>
    %35 = tpu.matmul %33, %34, %cst_19 {dimension_numbers = #tpu.dot_dimension_numbers<[1], [0], [0], [1], [0, 0, 1, 1], [], []>} : vector<32x128xf32>, vector<128x32xf32>, vector<32x32xf32> -> vector<32x32xf32>
    %c0_20 = arith.constant 0 : index
    %c0_21 = arith.constant 0 : index
    %36 = vector.load %arg8[%c0_20, %c0_21] : memref<1x32xf32, #tpu.memory_space<vmem>>, vector<1x32xf32>
    %37 = vector.broadcast %36 : vector<1x32xf32> to vector<32x32xf32>
    %38 = arith.addf %35, %37 : vector<32x32xf32>
    %39 = arith.addf %26, %38 : vector<32x32xf32>
    %cst_22 = arith.constant dense<0.000000e+00> : vector<32xf32>
    %40 = vector.multi_reduction <add>, %39, %cst_22 [1] : vector<32x32xf32> to vector<32xf32>
    %41 = vector.shape_cast %40 : vector<32xf32> to vector<32x1xf32>
    %cst_23 = arith.constant 3.200000e+01 : f32
    %42 = vector.broadcast %cst_23 : f32 to vector<32x1xf32>
    %43 = arith.divf %41, %42 : vector<32x1xf32>
    %44 = vector.broadcast %43 : vector<32x1xf32> to vector<32x32xf32>
    %45 = arith.subf %39, %44 : vector<32x32xf32>
    %46 = arith.mulf %45, %45 : vector<32x32xf32>
    %cst_24 = arith.constant dense<0.000000e+00> : vector<32xf32>
    %47 = vector.multi_reduction <add>, %46, %cst_24 [1] : vector<32x32xf32> to vector<32xf32>
    %48 = vector.shape_cast %47 : vector<32xf32> to vector<32x1xf32>
    %cst_25 = arith.constant 3.200000e+01 : f32
    %49 = vector.broadcast %cst_25 : f32 to vector<32x1xf32>
    %50 = arith.divf %48, %49 : vector<32x1xf32>
    %51 = vector.broadcast %43 : vector<32x1xf32> to vector<32x32xf32>
    %52 = arith.subf %39, %51 : vector<32x32xf32>
    %cst_26 = arith.constant 9.99999974E-6 : f32
    %53 = vector.broadcast %cst_26 : f32 to vector<32x1xf32>
    %54 = arith.addf %50, %53 : vector<32x1xf32>
    %55 = math.rsqrt %54 : vector<32x1xf32>
    %56 = vector.broadcast %55 : vector<32x1xf32> to vector<32x32xf32>
    %57 = arith.mulf %52, %56 : vector<32x32xf32>
    %c0_27 = arith.constant 0 : index
    %c0_28 = arith.constant 0 : index
    %58 = vector.load %arg9[%c0_27, %c0_28] : memref<1x32xf32, #tpu.memory_space<vmem>>, vector<1x32xf32>
    %59 = vector.broadcast %58 : vector<1x32xf32> to vector<32x32xf32>
    %60 = arith.mulf %57, %59 : vector<32x32xf32>
    %c0_29 = arith.constant 0 : index
    %c0_30 = arith.constant 0 : index
    %61 = vector.load %arg10[%c0_29, %c0_30] : memref<1x32xf32, #tpu.memory_space<vmem>>, vector<1x32xf32>
    %62 = vector.broadcast %61 : vector<1x32xf32> to vector<32x32xf32>
    %63 = arith.addf %60, %62 : vector<32x32xf32>
    %c0_31 = arith.constant 0 : index
    %c0_32 = arith.constant 0 : index
    %64 = vector.load %arg11[%c0_31, %c0_32] : memref<32x32xf32, #tpu.memory_space<vmem>>, vector<32x32xf32>
    tpu.vector_store %arg11[%c0_31, %c0_32], %63 {strides = array<i32>} : memref<32x32xf32, #tpu.memory_space<vmem>>, vector<32x32xf32>,
    return
  }
  func.func @transform_0(%arg0: i32) -> (i32, i32) {
    %c0_i32 = arith.constant 0 : i32
    %c0_i32_0 = arith.constant 0 : i32
    return %arg0, %c0_i32 : i32, i32
  }
  func.func @transform_1(%arg0: i32) -> (i32, i32) {
    %c0_i32 = arith.constant 0 : i32
    %c0_i32_0 = arith.constant 0 : i32
    return %arg0, %c0_i32 : i32, i32
  }
  func.func @transform_2(%arg0: i32) -> (i32, i32) {
    %c0_i32 = arith.constant 0 : i32
    %c0_i32_0 = arith.constant 0 : i32
    %c0_i32_1 = arith.constant 0 : i32
    return %c0_i32, %c0_i32_0 : i32, i32
  }
  func.func @transform_3(%arg0: i32) -> (i32, i32) {
    %c0_i32 = arith.constant 0 : i32
    %c0_i32_0 = arith.constant 0 : i32
    %c0_i32_1 = arith.constant 0 : i32
    return %c0_i32, %c0_i32_0 : i32, i32
  }
  func.func @transform_4(%arg0: i32) -> (i32, i32) {
    %c0_i32 = arith.constant 0 : i32
    %c0_i32_0 = arith.constant 0 : i32
    %c0_i32_1 = arith.constant 0 : i32
    return %c0_i32, %c0_i32_0 : i32, i32
  }
  func.func @transform_5(%arg0: i32) -> (i32, i32) {
    %c0_i32 = arith.constant 0 : i32
    %c0_i32_0 = arith.constant 0 : i32
    %c0_i32_1 = arith.constant 0 : i32
    return %c0_i32, %c0_i32_0 : i32, i32
  }
  func.func @transform_6(%arg0: i32) -> (i32, i32) {
    %c0_i32 = arith.constant 0 : i32
    %c0_i32_0 = arith.constant 0 : i32
    %c0_i32_1 = arith.constant 0 : i32
    return %c0_i32, %c0_i32_0 : i32, i32
  }
  func.func @transform_7(%arg0: i32) -> (i32, i32) {
    %c0_i32 = arith.constant 0 : i32
    %c0_i32_0 = arith.constant 0 : i32
    %c0_i32_1 = arith.constant 0 : i32
    return %c0_i32, %c0_i32_0 : i32, i32
  }
  func.func @transform_8(%arg0: i32) -> (i32, i32) {
    %c0_i32 = arith.constant 0 : i32
    %c0_i32_0 = arith.constant 0 : i32
    %c0_i32_1 = arith.constant 0 : i32
    return %c0_i32, %c0_i32_0 : i32, i32
  }
  func.func @transform_9(%arg0: i32) -> (i32, i32) {
    %c0_i32 = arith.constant 0 : i32
    %c0_i32_0 = arith.constant 0 : i32
    %c0_i32_1 = arith.constant 0 : i32
    return %c0_i32, %c0_i32_0 : i32, i32
  }
  func.func @transform_10(%arg0: i32) -> (i32, i32) {
    %c0_i32 = arith.constant 0 : i32
    %c0_i32_0 = arith.constant 0 : i32
    return %arg0, %c0_i32 : i32, i32
  }
}

module attributes {stable_mosaic.version = 11 : i64} {
  func.func @_attn_kernel(%arg0: i32, %arg1: memref<1x4x8x8xf32, #tpu.memory_space<vmem>>, %arg2: memref<1x4x16x8xf32, #tpu.memory_space<vmem>>, %arg3: memref<1x4x16x8xf32, #tpu.memory_space<vmem>>, %arg4: memref<4x8x32xf32, #tpu.memory_space<vmem>>, %arg5: memref<1x32xf32, #tpu.memory_space<vmem>>, %arg6: memref<1x8x32xf32, #tpu.memory_space<vmem>>) attributes {dimension_semantics = [#tpu.dimension_semantics<parallel>], iteration_bounds = array<i64: 2>, scalar_prefetch = 0 : i64, scratch_operands = 0 : i64, tpu.core_type = #tpu.core_type<tc>, window_params = [{transform_indices = @transform_0, window_bounds = array<i64: 1, 4, 8, 8>}, {transform_indices = @transform_1, window_bounds = array<i64: 1, 4, 16, 8>}, {transform_indices = @transform_2, window_bounds = array<i64: 1, 4, 16, 8>}, {pipeline_mode = #tpu.pipeline_mode<synchronous>, transform_indices = @transform_3, window_bounds = array<i64: 4, 8, 32>}, {pipeline_mode = #tpu.pipeline_mode<synchronous>, transform_indices = @transform_4, window_bounds = array<i64: 1, 32>}, {transform_indices = @transform_5, window_bounds = array<i64: 1, 8, 32>}]} {
    %c0 = arith.constant 0 : index
    %c0_0 = arith.constant 0 : index
    %c0_1 = arith.constant 0 : index
    %c0_2 = arith.constant 0 : index
    %0 = vector.load %arg1[%c0, %c0_0, %c0_1, %c0_2] : memref<1x4x8x8xf32, #tpu.memory_space<vmem>>, vector<1x4x8x8xf32>
    %1 = vector.shape_cast %0 : vector<1x4x8x8xf32> to vector<4x8x8xf32>
    %c0_3 = arith.constant 0 : index
    %c0_4 = arith.constant 0 : index
    %c0_5 = arith.constant 0 : index
    %c0_6 = arith.constant 0 : index
    %2 = vector.load %arg2[%c0_3, %c0_4, %c0_5, %c0_6] : memref<1x4x16x8xf32, #tpu.memory_space<vmem>>, vector<1x4x16x8xf32>
    %3 = vector.shape_cast %2 : vector<1x4x16x8xf32> to vector<4x16x8xf32>
    %c0_7 = arith.constant 0 : index
    %c0_8 = arith.constant 0 : index
    %c0_9 = arith.constant 0 : index
    %c0_10 = arith.constant 0 : index
    %4 = vector.load %arg3[%c0_7, %c0_8, %c0_9, %c0_10] : memref<1x4x16x8xf32, #tpu.memory_space<vmem>>, vector<1x4x16x8xf32>
    %5 = vector.shape_cast %4 : vector<1x4x16x8xf32> to vector<4x16x8xf32>
    %cst = arith.constant dense<0.000000e+00> : vector<4x8x16xf32>
    %6 = tpu.matmul %1, %3, %cst {dimension_numbers = #tpu.dot_dimension_numbers<[2], [2], [1], [1], [0, 0, 0, 1, 1, 1], [0], [0]>} : vector<4x8x8xf32>, vector<4x16x8xf32>, vector<4x8x16xf32> -> vector<4x8x16xf32>
    %cst_11 = arith.constant dense<0xFF800000> : vector<4x8xf32>
    %7 = vector.multi_reduction <maximumf>, %6, %cst_11 [2] : vector<4x8x16xf32> to vector<4x8xf32>
    %8 = vector.shape_cast %7 : vector<4x8xf32> to vector<4x8x1xf32>
    %9 = vector.broadcast %8 : vector<4x8x1xf32> to vector<4x8x16xf32>
    %10 = arith.subf %6, %9 : vector<4x8x16xf32>
    %11 = math.exp %10 : vector<4x8x16xf32>
    %cst_12 = arith.constant dense<0.000000e+00> : vector<4x8xf32>
    %12 = vector.multi_reduction <add>, %11, %cst_12 [2] : vector<4x8x16xf32> to vector<4x8xf32>
    %13 = vector.shape_cast %12 : vector<4x8xf32> to vector<4x8x1xf32>
    %14 = tpu.reciprocal %13 {approx = true} : vector<4x8x1xf32> -> vector<4x8x1xf32>
    %15 = vector.broadcast %14 : vector<4x8x1xf32> to vector<4x8x16xf32>
    %16 = arith.mulf %11, %15 : vector<4x8x16xf32>
    %cst_13 = arith.constant dense<0.000000e+00> : vector<4x8x8xf32>
    %17 = tpu.matmul %16, %5, %cst_13 {dimension_numbers = #tpu.dot_dimension_numbers<[2], [1], [1], [2], [0, 0, 0, 1, 1, 2], [0], [0]>} : vector<4x8x16xf32>, vector<4x16x8xf32>, vector<4x8x8xf32> -> vector<4x8x8xf32>
    %c0_14 = arith.constant 0 : index
    %c0_15 = arith.constant 0 : index
    %c0_16 = arith.constant 0 : index
    %18 = vector.load %arg4[%c0_14, %c0_15, %c0_16] : memref<4x8x32xf32, #tpu.memory_space<vmem>>, vector<4x8x32xf32>
    %cst_17 = arith.constant dense<0.000000e+00> : vector<4x8x32xf32>
    %19 = tpu.matmul %17, %18, %cst_17 {dimension_numbers = #tpu.dot_dimension_numbers<[2], [1], [1], [2], [0, 0, 0, 1, 1, 2], [0], [0]>} : vector<4x8x8xf32>, vector<4x8x32xf32>, vector<4x8x32xf32> -> vector<4x8x32xf32>
    %cst_18 = arith.constant dense<0.000000e+00> : vector<8x32xf32>
    %20 = vector.multi_reduction <add>, %19, %cst_18 [0] : vector<4x8x32xf32> to vector<8x32xf32>
    %c0_19 = arith.constant 0 : index
    %c0_20 = arith.constant 0 : index
    %21 = vector.load %arg5[%c0_19, %c0_20] : memref<1x32xf32, #tpu.memory_space<vmem>>, vector<1x32xf32>
    %22 = vector.broadcast %21 : vector<1x32xf32> to vector<8x32xf32>
    %23 = arith.addf %20, %22 : vector<8x32xf32>
    %c0_21 = arith.constant 0 : index
    %c0_22 = arith.constant 0 : index
    %c0_23 = arith.constant 0 : index
    %24 = vector.load %arg6[%c0_21, %c0_22, %c0_23] : memref<1x8x32xf32, #tpu.memory_space<vmem>>, vector<1x8x32xf32>
    %25 = vector.shape_cast %24 : vector<1x8x32xf32> to vector<8x32xf32>
    %26 = vector.shape_cast %23 : vector<8x32xf32> to vector<1x8x32xf32>
    tpu.vector_store %arg6[%c0_21, %c0_22, %c0_23], %26 {strides = array<i32>} : memref<1x8x32xf32, #tpu.memory_space<vmem>>, vector<1x8x32xf32>,
    return
  }
  func.func @transform_0(%arg0: i32) -> (i32, i32, i32, i32) {
    %c0_i32 = arith.constant 0 : i32
    %c0_i32_0 = arith.constant 0 : i32
    %c0_i32_1 = arith.constant 0 : i32
    %c0_i32_2 = arith.constant 0 : i32
    return %arg0, %c0_i32, %c0_i32_0, %c0_i32_1 : i32, i32, i32, i32
  }
  func.func @transform_1(%arg0: i32) -> (i32, i32, i32, i32) {
    %c0_i32 = arith.constant 0 : i32
    %c0_i32_0 = arith.constant 0 : i32
    %c0_i32_1 = arith.constant 0 : i32
    %c0_i32_2 = arith.constant 0 : i32
    return %arg0, %c0_i32, %c0_i32_0, %c0_i32_1 : i32, i32, i32, i32
  }
  func.func @transform_2(%arg0: i32) -> (i32, i32, i32, i32) {
    %c0_i32 = arith.constant 0 : i32
    %c0_i32_0 = arith.constant 0 : i32
    %c0_i32_1 = arith.constant 0 : i32
    %c0_i32_2 = arith.constant 0 : i32
    return %arg0, %c0_i32, %c0_i32_0, %c0_i32_1 : i32, i32, i32, i32
  }
  func.func @transform_3(%arg0: i32) -> (i32, i32, i32) {
    %c0_i32 = arith.constant 0 : i32
    %c0_i32_0 = arith.constant 0 : i32
    %c0_i32_1 = arith.constant 0 : i32
    %c0_i32_2 = arith.constant 0 : i32
    return %c0_i32, %c0_i32_0, %c0_i32_1 : i32, i32, i32
  }
  func.func @transform_4(%arg0: i32) -> (i32, i32) {
    %c0_i32 = arith.constant 0 : i32
    %c0_i32_0 = arith.constant 0 : i32
    %c0_i32_1 = arith.constant 0 : i32
    return %c0_i32, %c0_i32_0 : i32, i32
  }
  func.func @transform_5(%arg0: i32) -> (i32, i32, i32) {
    %c0_i32 = arith.constant 0 : i32
    %c0_i32_0 = arith.constant 0 : i32
    %c0_i32_1 = arith.constant 0 : i32
    return %arg0, %c0_i32, %c0_i32_0 : i32, i32, i32
  }
}

module attributes {stable_mosaic.version = 11 : i64} {
  func.func @_ln_ffn_ln_kernel(%arg0: i32, %arg1: memref<16x32xf32, #tpu.memory_space<vmem>>, %arg2: memref<16x32xf32, #tpu.memory_space<vmem>>, %arg3: memref<1x32xf32, #tpu.memory_space<vmem>>, %arg4: memref<1x32xf32, #tpu.memory_space<vmem>>, %arg5: memref<32x128xf32, #tpu.memory_space<vmem>>, %arg6: memref<1x128xf32, #tpu.memory_space<vmem>>, %arg7: memref<128x32xf32, #tpu.memory_space<vmem>>, %arg8: memref<1x32xf32, #tpu.memory_space<vmem>>, %arg9: memref<1x32xf32, #tpu.memory_space<vmem>>, %arg10: memref<1x32xf32, #tpu.memory_space<vmem>>, %arg11: memref<16x32xf32, #tpu.memory_space<vmem>>) attributes {dimension_semantics = [#tpu.dimension_semantics<parallel>], iteration_bounds = array<i64: 1>, scalar_prefetch = 0 : i64, scratch_operands = 0 : i64, tpu.core_type = #tpu.core_type<tc>, window_params = [{transform_indices = @transform_0, window_bounds = array<i64: 16, 32>}, {transform_indices = @transform_1, window_bounds = array<i64: 16, 32>}, {pipeline_mode = #tpu.pipeline_mode<synchronous>, transform_indices = @transform_2, window_bounds = array<i64: 1, 32>}, {pipeline_mode = #tpu.pipeline_mode<synchronous>, transform_indices = @transform_3, window_bounds = array<i64: 1, 32>}, {pipeline_mode = #tpu.pipeline_mode<synchronous>, transform_indices = @transform_4, window_bounds = array<i64: 32, 128>}, {pipeline_mode = #tpu.pipeline_mode<synchronous>, transform_indices = @transform_5, window_bounds = array<i64: 1, 128>}, {pipeline_mode = #tpu.pipeline_mode<synchronous>, transform_indices = @transform_6, window_bounds = array<i64: 128, 32>}, {pipeline_mode = #tpu.pipeline_mode<synchronous>, transform_indices = @transform_7, window_bounds = array<i64: 1, 32>}, {pipeline_mode = #tpu.pipeline_mode<synchronous>, transform_indices = @transform_8, window_bounds = array<i64: 1, 32>}, {pipeline_mode = #tpu.pipeline_mode<synchronous>, transform_indices = @transform_9, window_bounds = array<i64: 1, 32>}, {transform_indices = @transform_10, window_bounds = array<i64: 16, 32>}]} {
    %c0 = arith.constant 0 : index
    %c0_0 = arith.constant 0 : index
    %0 = vector.load %arg1[%c0, %c0_0] : memref<16x32xf32, #tpu.memory_space<vmem>>, vector<16x32xf32>
    %c0_1 = arith.constant 0 : index
    %c0_2 = arith.constant 0 : index
    %1 = vector.load %arg2[%c0_1, %c0_2] : memref<16x32xf32, #tpu.memory_space<vmem>>, vector<16x32xf32>
    %2 = arith.addf %0, %1 : vector<16x32xf32>
    %cst = arith.constant dense<0.000000e+00> : vector<16xf32>
    %3 = vector.multi_reduction <add>, %2, %cst [1] : vector<16x32xf32> to vector<16xf32>
    %4 = vector.shape_cast %3 : vector<16xf32> to vector<16x1xf32>
    %cst_3 = arith.constant 3.200000e+01 : f32
    %5 = vector.broadcast %cst_3 : f32 to vector<16x1xf32>
    %6 = arith.divf %4, %5 : vector<16x1xf32>
    %7 = vector.broadcast %6 : vector<16x1xf32> to vector<16x32xf32>
    %8 = arith.subf %2, %7 : vector<16x32xf32>
    %9 = arith.mulf %8, %8 : vector<16x32xf32>
    %cst_4 = arith.constant dense<0.000000e+00> : vector<16xf32>
    %10 = vector.multi_reduction <add>, %9, %cst_4 [1] : vector<16x32xf32> to vector<16xf32>
    %11 = vector.shape_cast %10 : vector<16xf32> to vector<16x1xf32>
    %cst_5 = arith.constant 3.200000e+01 : f32
    %12 = vector.broadcast %cst_5 : f32 to vector<16x1xf32>
    %13 = arith.divf %11, %12 : vector<16x1xf32>
    %14 = vector.broadcast %6 : vector<16x1xf32> to vector<16x32xf32>
    %15 = arith.subf %2, %14 : vector<16x32xf32>
    %cst_6 = arith.constant 9.99999974E-6 : f32
    %16 = vector.broadcast %cst_6 : f32 to vector<16x1xf32>
    %17 = arith.addf %13, %16 : vector<16x1xf32>
    %18 = math.rsqrt %17 : vector<16x1xf32>
    %19 = vector.broadcast %18 : vector<16x1xf32> to vector<16x32xf32>
    %20 = arith.mulf %15, %19 : vector<16x32xf32>
    %c0_7 = arith.constant 0 : index
    %c0_8 = arith.constant 0 : index
    %21 = vector.load %arg3[%c0_7, %c0_8] : memref<1x32xf32, #tpu.memory_space<vmem>>, vector<1x32xf32>
    %22 = vector.broadcast %21 : vector<1x32xf32> to vector<16x32xf32>
    %23 = arith.mulf %20, %22 : vector<16x32xf32>
    %c0_9 = arith.constant 0 : index
    %c0_10 = arith.constant 0 : index
    %24 = vector.load %arg4[%c0_9, %c0_10] : memref<1x32xf32, #tpu.memory_space<vmem>>, vector<1x32xf32>
    %25 = vector.broadcast %24 : vector<1x32xf32> to vector<16x32xf32>
    %26 = arith.addf %23, %25 : vector<16x32xf32>
    %c0_11 = arith.constant 0 : index
    %c0_12 = arith.constant 0 : index
    %27 = vector.load %arg5[%c0_11, %c0_12] : memref<32x128xf32, #tpu.memory_space<vmem>>, vector<32x128xf32>
    %cst_13 = arith.constant dense<0.000000e+00> : vector<16x128xf32>
    %28 = tpu.matmul %26, %27, %cst_13 {dimension_numbers = #tpu.dot_dimension_numbers<[1], [0], [0], [1], [0, 0, 1, 1], [], []>} : vector<16x32xf32>, vector<32x128xf32>, vector<16x128xf32> -> vector<16x128xf32>
    %c0_14 = arith.constant 0 : index
    %c0_15 = arith.constant 0 : index
    %29 = vector.load %arg6[%c0_14, %c0_15] : memref<1x128xf32, #tpu.memory_space<vmem>>, vector<1x128xf32>
    %30 = vector.broadcast %29 : vector<1x128xf32> to vector<16x128xf32>
    %31 = arith.addf %28, %30 : vector<16x128xf32>
    %cst_16 = arith.constant 0.000000e+00 : f32
    %32 = vector.broadcast %cst_16 : f32 to vector<16x128xf32>
    %33 = arith.maximumf %31, %32 : vector<16x128xf32>
    %c0_17 = arith.constant 0 : index
    %c0_18 = arith.constant 0 : index
    %34 = vector.load %arg7[%c0_17, %c0_18] : memref<128x32xf32, #tpu.memory_space<vmem>>, vector<128x32xf32>
    %cst_19 = arith.constant dense<0.000000e+00> : vector<16x32xf32>
    %35 = tpu.matmul %33, %34, %cst_19 {dimension_numbers = #tpu.dot_dimension_numbers<[1], [0], [0], [1], [0, 0, 1, 1], [], []>} : vector<16x128xf32>, vector<128x32xf32>, vector<16x32xf32> -> vector<16x32xf32>
    %c0_20 = arith.constant 0 : index
    %c0_21 = arith.constant 0 : index
    %36 = vector.load %arg8[%c0_20, %c0_21] : memref<1x32xf32, #tpu.memory_space<vmem>>, vector<1x32xf32>
    %37 = vector.broadcast %36 : vector<1x32xf32> to vector<16x32xf32>
    %38 = arith.addf %35, %37 : vector<16x32xf32>
    %39 = arith.addf %26, %38 : vector<16x32xf32>
    %cst_22 = arith.constant dense<0.000000e+00> : vector<16xf32>
    %40 = vector.multi_reduction <add>, %39, %cst_22 [1] : vector<16x32xf32> to vector<16xf32>
    %41 = vector.shape_cast %40 : vector<16xf32> to vector<16x1xf32>
    %cst_23 = arith.constant 3.200000e+01 : f32
    %42 = vector.broadcast %cst_23 : f32 to vector<16x1xf32>
    %43 = arith.divf %41, %42 : vector<16x1xf32>
    %44 = vector.broadcast %43 : vector<16x1xf32> to vector<16x32xf32>
    %45 = arith.subf %39, %44 : vector<16x32xf32>
    %46 = arith.mulf %45, %45 : vector<16x32xf32>
    %cst_24 = arith.constant dense<0.000000e+00> : vector<16xf32>
    %47 = vector.multi_reduction <add>, %46, %cst_24 [1] : vector<16x32xf32> to vector<16xf32>
    %48 = vector.shape_cast %47 : vector<16xf32> to vector<16x1xf32>
    %cst_25 = arith.constant 3.200000e+01 : f32
    %49 = vector.broadcast %cst_25 : f32 to vector<16x1xf32>
    %50 = arith.divf %48, %49 : vector<16x1xf32>
    %51 = vector.broadcast %43 : vector<16x1xf32> to vector<16x32xf32>
    %52 = arith.subf %39, %51 : vector<16x32xf32>
    %cst_26 = arith.constant 9.99999974E-6 : f32
    %53 = vector.broadcast %cst_26 : f32 to vector<16x1xf32>
    %54 = arith.addf %50, %53 : vector<16x1xf32>
    %55 = math.rsqrt %54 : vector<16x1xf32>
    %56 = vector.broadcast %55 : vector<16x1xf32> to vector<16x32xf32>
    %57 = arith.mulf %52, %56 : vector<16x32xf32>
    %c0_27 = arith.constant 0 : index
    %c0_28 = arith.constant 0 : index
    %58 = vector.load %arg9[%c0_27, %c0_28] : memref<1x32xf32, #tpu.memory_space<vmem>>, vector<1x32xf32>
    %59 = vector.broadcast %58 : vector<1x32xf32> to vector<16x32xf32>
    %60 = arith.mulf %57, %59 : vector<16x32xf32>
    %c0_29 = arith.constant 0 : index
    %c0_30 = arith.constant 0 : index
    %61 = vector.load %arg10[%c0_29, %c0_30] : memref<1x32xf32, #tpu.memory_space<vmem>>, vector<1x32xf32>
    %62 = vector.broadcast %61 : vector<1x32xf32> to vector<16x32xf32>
    %63 = arith.addf %60, %62 : vector<16x32xf32>
    %c0_31 = arith.constant 0 : index
    %c0_32 = arith.constant 0 : index
    %64 = vector.load %arg11[%c0_31, %c0_32] : memref<16x32xf32, #tpu.memory_space<vmem>>, vector<16x32xf32>
    tpu.vector_store %arg11[%c0_31, %c0_32], %63 {strides = array<i32>} : memref<16x32xf32, #tpu.memory_space<vmem>>, vector<16x32xf32>,
    return
  }
  func.func @transform_0(%arg0: i32) -> (i32, i32) {
    %c0_i32 = arith.constant 0 : i32
    %c0_i32_0 = arith.constant 0 : i32
    return %arg0, %c0_i32 : i32, i32
  }
  func.func @transform_1(%arg0: i32) -> (i32, i32) {
    %c0_i32 = arith.constant 0 : i32
    %c0_i32_0 = arith.constant 0 : i32
    return %arg0, %c0_i32 : i32, i32
  }
  func.func @transform_2(%arg0: i32) -> (i32, i32) {
    %c0_i32 = arith.constant 0 : i32
    %c0_i32_0 = arith.constant 0 : i32
    %c0_i32_1 = arith.constant 0 : i32
    return %c0_i32, %c0_i32_0 : i32, i32
  }
  func.func @transform_3(%arg0: i32) -> (i32, i32) {
    %c0_i32 = arith.constant 0 : i32
    %c0_i32_0 = arith.constant 0 : i32
    %c0_i32_1 = arith.constant 0 : i32
    return %c0_i32, %c0_i32_0 : i32, i32
  }
  func.func @transform_4(%arg0: i32) -> (i32, i32) {
    %c0_i32 = arith.constant 0 : i32
    %c0_i32_0 = arith.constant 0 : i32
    %c0_i32_1 = arith.constant 0 : i32
    return %c0_i32, %c0_i32_0 : i32, i32
  }
  func.func @transform_5(%arg0: i32) -> (i32, i32) {
    %c0_i32 = arith.constant 0 : i32
    %c0_i32_0 = arith.constant 0 : i32
    %c0_i32_1 = arith.constant 0 : i32
    return %c0_i32, %c0_i32_0 : i32, i32
  }
  func.func @transform_6(%arg0: i32) -> (i32, i32) {
    %c0_i32 = arith.constant 0 : i32
    %c0_i32_0 = arith.constant 0 : i32
    %c0_i32_1 = arith.constant 0 : i32
    return %c0_i32, %c0_i32_0 : i32, i32
  }
  func.func @transform_7(%arg0: i32) -> (i32, i32) {
    %c0_i32 = arith.constant 0 : i32
    %c0_i32_0 = arith.constant 0 : i32
    %c0_i32_1 = arith.constant 0 : i32
    return %c0_i32, %c0_i32_0 : i32, i32
  }
  func.func @transform_8(%arg0: i32) -> (i32, i32) {
    %c0_i32 = arith.constant 0 : i32
    %c0_i32_0 = arith.constant 0 : i32
    %c0_i32_1 = arith.constant 0 : i32
    return %c0_i32, %c0_i32_0 : i32, i32
  }
  func.func @transform_9(%arg0: i32) -> (i32, i32) {
    %c0_i32 = arith.constant 0 : i32
    %c0_i32_0 = arith.constant 0 : i32
    %c0_i32_1 = arith.constant 0 : i32
    return %c0_i32, %c0_i32_0 : i32, i32
  }
  func.func @transform_10(%arg0: i32) -> (i32, i32) {
    %c0_i32 = arith.constant 0 : i32
    %c0_i32_0 = arith.constant 0 : i32
    return %arg0, %c0_i32 : i32, i32
  }
}

</mosaic_0001>

<bundles_post_ra>
// kernel: cross_attention_forward.6
= control target key start
LH: loop header
LB: loop body
LE: loop exit
PB: predicated region body
PF: predicated region fallthrough
CT: control target
= control target key end

     0   :  { %vm24_vm0 = vcmask 261120   ;;  %vm54_vm1 = vcmask 785408   ;;  %s115_s1 = inlined_call_operand.vmem [shape: f32[32,96], index: 1, kind: input, shape index: {}]   ;;  %s116_s2 = inlined_call_operand.vmem [shape: f32[1,96], index: 2, kind: input, shape index: {}]   ;;  %s117_s0 = inlined_call_operand.vmem [shape: f32[16,32], index: 0, kind: input, shape index: {}]   ;;  %s118_s3 = inlined_call_operand.vmem [shape: f32[16,96], index: 3, kind: output, shape index: {}]  }
   0x1   :  { %v19_v0 = vld [vmem:[%s115_s1 + $0x18] sm:$0xff]  ;;  %v18_v1 = vld [vmem:[%s115_s1 + $0x10] sm:$0xff]  ;;  %v17_v2 = vld [vmem:[%s115_s1 + $0x8] sm:$0xff] }
   0x2   :  { %43 = vmatpush.msra.mxu0 %v19_v0  ;;  %63 = vmatpush.msra.mxu1 %v19_v0  ;;  %v16_v3 = vld [vmem:[%s115_s1] sm:$0xff]  ;;  %v15_v5 = vld [vmem:[%s117_s0 + $0x8] sm:$0xff] }
   0x3   :  { %v14_v4 = vld [vmem:[%s117_s0] sm:$0xff] }
   0x4   :  { %44 = vmatpush.msra.mxu0 %v18_v1  ;;  %64 = vmatpush.msra.mxu1 %v18_v1  ;;  %v67_v6 = vld [vmem:[%s116_s2] ss:$0 sm:$0xff] }
   0x6   :  { %45 = vmatpush.msra.mxu0 %v17_v2  ;;  %65 = vmatpush.msra.mxu1 %v17_v2 }
   0x8   :  { %46 = vmatpush.msra.mxu0 %v16_v3  ;;  %66 = vmatpush.msra.mxu1 %v16_v3 }
   0x9   :  { %61 = vmatmul.msk.f32.vlgmr.msra.gmra.mxu0 %vm24_vm0, %v14_v4  ;;  %62 = vmatmul.msk.f32.vlgmr.msra.gmra.mxu1 %vm24_vm0, %v15_v5 }
  0x86   :  { %v48_v7 = vpop.f32.mrf.mxu0  ;;  %v51_v8 = vpop.f32.mrf.mxu1 }
  0x87   :  { %v49_v9 = vadd.f32 %v67_v6, %v48_v7  ;;  %v52_v10 = vadd.f32 %v67_v6, %v51_v8 }
  0x89   :  { %55 = vst.msk [vmem:[%s118_s3] sm:$0xff] %vm54_vm1, %v49_v9 }
  0x8a   :  { %56 = vst.msk [vmem:[%s118_s3 + $0x8] sm:$0xff] %vm54_vm1, %v52_v10 }

// kernel: cross_attention_forward.7
= control target key start
LH: loop header
LB: loop body
LE: loop exit
PB: predicated region body
PF: predicated region fallthrough
CT: control target
= control target key end

     0   :  { %vm26_vm0 = vcmask 261120   ;;  %vm68_vm1 = vcmask 785408   ;;  %s153_s1 = inlined_call_operand.vmem [shape: f32[32,96], index: 1, kind: input, shape index: {}]   ;;  %s154_s2 = inlined_call_operand.vmem [shape: f32[1,96], index: 2, kind: input, shape index: {}]   ;;  %s155_s0 = inlined_call_operand.vmem [shape: f32[32,32], index: 0, kind: input, shape index: {}]   ;;  %s156_s3 = inlined_call_operand.vmem [shape: f32[32,96], index: 3, kind: output, shape index: {}]  }
   0x1   :  { %v21_v0 = vld [vmem:[%s153_s1 + $0x18] sm:$0xff]  ;;  %v20_v1 = vld [vmem:[%s153_s1 + $0x10] sm:$0xff]  ;;  %v19_v2 = vld [vmem:[%s153_s1 + $0x8] sm:$0xff] }
   0x2   :  { %82 = vmatpush.msra.mxu2 %v21_v0  ;;  %83 = vmatpush.msra.mxu3 %v21_v0  ;;  %v18_v3 = vld [vmem:[%s153_s1] sm:$0xff]  ;;  %v16_v4 = vld [vmem:[%s155_s0 + $0x10] sm:$0xff]  ;;  %v17_v5 = vld [vmem:[%s155_s0 + $0x18] sm:$0xff] }
   0x3   :  { %51 = vmatpush.msra.mxu0 %v21_v0  ;;  %81 = vmatpush.msra.mxu1 %v21_v0  ;;  %v14_v6 = vld [vmem:[%s155_s0] sm:$0xff]  ;;  %v15_v7 = vld [vmem:[%s155_s0 + $0x8] sm:$0xff] }
   0x4   :  { %85 = vmatpush.msra.mxu2 %v20_v1  ;;  %86 = vmatpush.msra.mxu3 %v20_v1  ;;  %v93_v8 = vld [vmem:[%s154_s2] ss:$0 sm:$0xff] }
   0x5   :  { %52 = vmatpush.msra.mxu0 %v20_v1  ;;  %84 = vmatpush.msra.mxu1 %v20_v1 }
   0x6   :  { %88 = vmatpush.msra.mxu2 %v19_v2  ;;  %89 = vmatpush.msra.mxu3 %v19_v2 }
   0x7   :  { %53 = vmatpush.msra.mxu0 %v19_v2  ;;  %87 = vmatpush.msra.mxu1 %v19_v2 }
   0x8   :  { %91 = vmatpush.msra.mxu2 %v18_v3  ;;  %92 = vmatpush.msra.mxu3 %v18_v3 }
   0x9   :  { %79 = vmatmul.msk.f32.vlgmr.msra.gmra.mxu2 %vm26_vm0, %v16_v4  ;;  %80 = vmatmul.msk.f32.vlgmr.msra.gmra.mxu3 %vm26_vm0, %v17_v5 }
   0xa   :  { %54 = vmatpush.msra.mxu0 %v18_v3  ;;  %90 = vmatpush.msra.mxu1 %v18_v3 }
   0xb   :  { %77 = vmatmul.msk.f32.vlgmr.msra.gmra.mxu0 %vm26_vm0, %v14_v6  ;;  %78 = vmatmul.msk.f32.vlgmr.msra.gmra.mxu1 %vm26_vm0, %v15_v7 }
  0x88   :  { %v56_v9 = vpop.f32.mrf.mxu0  ;;  %v59_v10 = vpop.f32.mrf.mxu1 }
  0x89   :  { %v57_v11 = vadd.f32 %v93_v8, %v56_v9  ;;  %v60_v12 = vadd.f32 %v93_v8, %v59_v10 }
  0x8b   :  { %69 = vst.msk [vmem:[%s156_s3] sm:$0xff] %vm68_vm1, %v57_v11 }
  0x8c   :  { %70 = vst.msk [vmem:[%s156_s3 + $0x8] sm:$0xff] %vm68_vm1, %v60_v12  ;;  %v62_v13 = vpop.f32.mrf.mxu2  ;;  %v65_v14 = vpop.f32.mrf.mxu3 }
  0x8d   :  { %v63_v15 = vadd.f32 %v93_v8, %v62_v13  ;;  %v66_v16 = vadd.f32 %v93_v8, %v65_v14 }
  0x8f   :  { %71 = vst.msk [vmem:[%s156_s3 + $0x10] sm:$0xff] %vm68_vm1, %v63_v15 }
  0x90   :  { %72 = vst.msk [vmem:[%s156_s3 + $0x18] sm:$0xff] %vm68_vm1, %v66_v16 }

// kernel: cross_attention_forward.9
= control target key start
LH: loop header
LB: loop body
LE: loop exit
PB: predicated region body
PF: predicated region fallthrough
CT: control target
= control target key end

     0   :  { %s962_s18 = smov 0   ;;  %s1077_s0 = inlined_call_operand.vmem [shape: f32[2,4,16,8], index: 0, kind: input, shape index: {}]   ;;  %s1078_s1 = inlined_call_operand.vmem [shape: f32[2,4,8,8], index: 1, kind: input, shape index: {}]   ;;  %s1079_s2 = inlined_call_operand.vmem [shape: f32[2,4,8,8], index: 2, kind: input, shape index: {}]   ;;  %s1080_s3 = inlined_call_operand.vmem [shape: f32[4,8,32], index: 3, kind: input, shape index: {}]   ;;  %s1081_s4 = inlined_call_operand.vmem [shape: f32[1,32], index: 4, kind: input, shape index: {}]   ;;  %s1082_s5 = inlined_call_operand.vmem [shape: f32[2,16,32], index: 5, kind: output, shape index: {}]  }
   0x1 LB: > { %s836_s19 = sadd.s32 4294967295, %s930_s18   ;;  %p840_p0 = scmp.ge.s32.totalorder %s930_s18, 1  ;;  %s930_s18 = sphi %s962_s18, %s15_s18  }
   0x2   : > { %p207_p1 = scmp.lt.s32.totalorder %s930_s18, 3 }
   0x4   : > { %p208_p2 = pnand %p840_p0, %p207_p1 }
   0x5   : > { %p245_p3 = scmp.lt.s32.totalorder (!%p208_p2), %s836_s19, 1 }
   0x6   : > { %211 = sbr.rel (%p208_p2) target bundleno = 692 (0x2b4), region = 40 }
   0xb   : > { %s1084_s19 = smov (!%p245_p3, %s836_s19), 1  ;;  %vm281_vm0 = vcmask 64512   ;;  %vm734_vm1 = vcmask 261120  }
   0xc   : > { %s879_s20 = sshll.u32 %s1084_s19, 6  ;;  %s880_s21 = sshll.u32 %s1084_s19, 5 }
   0xd   : > { %s249_s24 = scalar_lea.vmem %s1077_s0, %s879_s20  ;;  %s254_s27 = scalar_lea.vmem %s1078_s1, %s880_s21 }
   0xe   : > { %v274_v0 = vld [vmem:[%s254_s27 + $0x8] sm:$0xff]  ;;  %v275_v1 = vld [vmem:[%s254_s27 + $0x10] sm:$0xff]  ;;  %v276_v2 = vld [vmem:[%s254_s27 + $0x18] sm:$0xff]  ;;  %s1007_s30 = scalar_lea.vmem %s1079_s2, %s880_s21  ;;  %s882_s14 = sshll.u32 %s1084_s19, 4 }
   0xf   : > { %852 = vmatpush.xpose.msk.msra.mxu1 %vm281_vm0, %v274_v0  ;;  %855 = vmatpush.xpose.msk.msra.mxu2 %vm281_vm0, %v275_v1  ;;  %v267_v3 = vld [vmem:[%s249_s24 + $0x10] sm:$0xff]  ;;  %v269_v4 = vld [vmem:[%s249_s24 + $0x20] sm:$0xff]  ;;  %v270_v8 = vld [vmem:[%s249_s24 + $0x28] sm:$0xff]  ;;  %s264_s21 = scalar_lea.vmem %s1082_s5, %s882_s14 }
  0x10   : > { %858 = vmatpush.xpose.msk.msra.mxu3 %vm281_vm0, %v276_v2  ;;  %v271_v5 = vld [vmem:[%s249_s24 + $0x30] sm:$0xff]  ;;  %v273_v6 = vld [vmem:[%s254_s27] sm:$0xff]  ;;  %v268_v9 = vld [vmem:[%s249_s24 + $0x18] sm:$0xff] }
  0x11   : > { %849 = vmatpush.xpose.msk.msra.mxu0 %vm281_vm0, %v273_v6  ;;  %v265_v7 = vld [vmem:[%s249_s24] sm:$0xff]  ;;  %v272_v10 = vld [vmem:[%s249_s24 + $0x38] sm:$0xff]  ;;  %v266_v11 = vld [vmem:[%s249_s24 + $0x8] sm:$0xff] }
  0x12   : > { %853 = vmatmul.msk.f32.vlgmr.msra.gmra.mxu1 %vm281_vm0, %v267_v3  ;;  %856 = vmatmul.msk.f32.vlgmr.msra.gmra.mxu2 %vm281_vm0, %v269_v4  ;;  %v279_v32 = vld [vmem:[%s1007_s30 + $0x10] sm:$0xff]  ;;  %v277_v6 = vld [vmem:[%s1007_s30] sm:$0xff] }
  0x13   : > { %859 = vmatmul.msk.f32.vlgmr.msra.gmra.mxu3 %vm281_vm0, %v271_v5  ;;  %577 = vmatpush.msrb.mxu2 %v279_v32  ;;  %v280_v5 = vld [vmem:[%s1007_s30 + $0x18] sm:$0xff] }
  0x14   : > { %850 = vmatmul.msk.f32.vlgmr.msra.gmra.mxu0 %vm281_vm0, %v265_v7  ;;  %606 = vmatpush.msrb.mxu3 %v280_v5  ;;  %v278_v7 = vld [vmem:[%s1007_s30 + $0x8] sm:$0xff] }
  0x15   : > { %519 = vmatpush.msrb.mxu0 %v277_v6  ;;  %548 = vmatpush.msrb.mxu1 %v278_v7 }
  0x1a   : > { %857 = vmatmul.msk.f32.gmra.mxu2 %vm281_vm0, %v270_v8  ;;  %854 = vmatmul.msk.f32.gmra.mxu1 %vm281_vm0, %v268_v9  ;;  %v616_v9 = vld [vmem:[%s1080_s3 + $0x10] sm:$0xff] }
  0x1b   : > { %860 = vmatmul.msk.f32.gmra.mxu3 %vm281_vm0, %v272_v10  ;;  %v617_v10 = vld [vmem:[%s1080_s3 + $0x18] sm:$0xff]  ;;  %697 = vmatpush.msra.mxu2 %v616_v9 }
  0x1c   : > { %851 = vmatmul.msk.f32.gmra.mxu0 %vm281_vm0, %v266_v11  ;;  %v614_v11 = vld [vmem:[%s1080_s3] sm:$0xff]  ;;  %726 = vmatpush.msra.mxu3 %v617_v10 }
  0x1d   : > { %639 = vmatpush.msra.mxu0 %v614_v11 }
  0x8f   : > { %v340_v12 = vpop.f32.mrf.mxu1 }
  0x90   : > { %v416_v13 = vsel %vm281_vm0, %v340_v12, -inf }
  0x91   : > { %417 = vmax.xlane.f32.xlu2 %v416_v13  ;;  %v308_v17 = vpop.f32.mrf.mxu0 }
  0x92   : > { %v410_v24 = vsel %vm281_vm0, %v308_v17, -inf }
  0x95   : > { %v372_v14 = vpop.f32.mrf.mxu2 }
  0x96   : > { %v404_v15 = vpop.f32.mrf.mxu3  ;;  %v422_v16 = vsel %vm281_vm0, %v372_v14, -inf }
  0x97   : > { %423 = vmax.xlane.f32.xlu0 %v422_v16  ;;  %v428_v18 = vsel %vm281_vm0, %v404_v15, -inf  ;;  %v343_v26 = vpop.f32.mrf.mxu1 }
  0x98   : > { %v419_v27 = vsel %vm281_vm0, %v343_v26, -inf }
  0x99   : > { %v311_v23 = vpop.f32.mrf.mxu0 }
  0x9a   : > { %v413_v25 = vsel %vm281_vm0, %v311_v23, -inf }
  0x9d   : > { %v375_v19 = vpop.f32.mrf.mxu2 }
  0x9e   : > { %v407_v20 = vpop.f32.mrf.mxu3  ;;  %v425_v21 = vsel %vm281_vm0, %v375_v19, -inf }
  0x9f   : > { %429 = vmax.xlane.f32.xlu0 %v428_v18  ;;  %426 = vmax.xlane.f32.xlu1 %v425_v21  ;;  %v431_v22 = vsel %vm281_vm0, %v407_v20, -inf }
  0xa0   : > { %432 = vmax.xlane.f32.xlu2 %v431_v22 }
  0xa7   : > { %411 = vmax.xlane.f32.xlu1 %v410_v24  ;;  %414 = vmax.xlane.f32.xlu0 %v413_v25 }
  0xaf   : > { %420 = vmax.xlane.f32.xlu1 %v419_v27 }
 0x104   : > { %v418_v29 = vpop.xlane.xlu2 %417 }
 0x105   : > { %v436_v39 = vsub.f32 %v340_v12, %v418_v29  ;;  %v615_v12 = vld [vmem:[%s1080_s3 + $0x8] sm:$0xff] }
 0x106   : > { %668 = vmatpush.msra.mxu1 %v615_v12 }
 0x107   : > { %v446_v44 = vmul.f32 1.442695, %v436_v39 }
 0x10a   : > { %v424_v28 = vpop.xlane.xlu0 %423 }
 0x10b   : > { %v438_v30 = vsub.f32 %v372_v14, %v424_v28 }
 0x10d   : > { %v450_v31 = vmul.f32 1.442695, %v438_v30 }
 0x10f   : > { %892 = vpow2.f32 %v450_v31 }
 0x112   : > { %v430_v33 = vpop.xlane.xlu0 %429  ;;  %v427_v34 = vpop.xlane.xlu1 %426 }
 0x113   : > { %v440_v35 = vsub.f32 %v404_v15, %v430_v33  ;;  %v439_v36 = vsub.f32 %v375_v19, %v427_v34  ;;  %v433_v37 = vpop.xlane.xlu2 %432 }
 0x114   : > { %v441_v42 = vsub.f32 %v407_v20, %v433_v37 }
 0x115   : > { %v1010_v38 = vpop.eup %892  ;;  %v454_v40 = vmul.f32 1.442695, %v440_v35  ;;  %v452_v41 = vmul.f32 1.442695, %v439_v36 }
 0x116   : > { %v470_v43 = vsel %vm281_vm0, %v1010_v38, 0.0  ;;  %v456_v45 = vmul.f32 1.442695, %v441_v42 }
 0x117   : > { %894 = vpow2.f32 %v454_v40  ;;  %471 = vadd.xlane.f32.xlu2 %v470_v43 }
 0x118   : > { %896 = vpow2.f32 %v452_v41 }
 0x119   : > { %898 = vpow2.f32 %v446_v44 }
 0x11a   : > { %v412_v46 = vpop.xlane.xlu1 %411  ;;  %v415_v47 = vpop.xlane.xlu0 %414  ;;  %900 = vpow2.f32 %v456_v45 }
 0x11b   : > { %v434_v48 = vsub.f32 %v308_v17, %v412_v46  ;;  %v435_v51 = vsub.f32 %v311_v23, %v415_v47 }
 0x11d   : > { %v895_v49 = vpop.eup %894  ;;  %v442_v50 = vmul.f32 1.442695, %v434_v48  ;;  %v444_v55 = vmul.f32 1.442695, %v435_v51 }
 0x11e   : > { %v897_v52 = vpop.eup %896  ;;  %v476_v53 = vsel %vm281_vm0, %v895_v49, 0.0 }
 0x11f   : > { %902 = vpow2.f32 %v442_v50  ;;  %v473_v54 = vsel %vm281_vm0, %v897_v52, 0.0  ;;  %477 = vadd.xlane.f32.xlu0 %v476_v53  ;;  %v1016_v57 = vpop.eup %898 }
 0x120   : > { %474 = vadd.xlane.f32.xlu1 %v473_v54  ;;  %v901_v59 = vpop.eup %900  ;;  %904 = vpow2.f32 %v444_v55  ;;  %v464_v63 = vsel %vm281_vm0, %v1016_v57, 0.0  ;;  %v891_v54 = vld [vmem:[%s1081_s4] ss:$0 sm:$0xff] }
 0x121   : > { %v479_v0 = vsel %vm281_vm0, %v901_v59, 0.0 }
 0x122   : > { %v421_v56 = vpop.xlane.xlu1 %420 }
 0x123   : > { %v437_v58 = vsub.f32 %v343_v26, %v421_v56 }
 0x125   : > { %v903_v60 = vpop.eup %902  ;;  %v448_v61 = vmul.f32 1.442695, %v437_v58 }
 0x126   : > { %v458_v62 = vsel %vm281_vm0, %v903_v60, 0.0  ;;  %v905_v1 = vpop.eup %904 }
 0x127   : > { %906 = vpow2.f32 %v448_v61  ;;  %459 = vadd.xlane.f32.xlu2 %v458_v62  ;;  %465 = vadd.xlane.f32.xlu0 %v464_v63  ;;  %v461_v4 = vsel %vm281_vm0, %v905_v1, 0.0 }
 0x128   : > { %480 = vadd.xlane.f32.xlu1 %v479_v0 }
 0x12d   : > { %v907_v2 = vpop.eup %906 }
 0x12e   : > { %v467_v3 = vsel %vm281_vm0, %v907_v2, 0.0 }
 0x12f   : > { %468 = vadd.xlane.f32.xlu0 %v467_v3  ;;  %462 = vadd.xlane.f32.xlu2 %v461_v4 }
 0x18a   : > { %v472_v8 = vpop.xlane.xlu2 %471 }
 0x18b   : > { %908 = vrcp.f32 %v472_v8 }
 0x191   : > { %v909_v13 = vpop.eup %908 }
 0x192   : > { %v478_v14 = vpop.xlane.xlu0 %477  ;;  %v494_v15 = vmul.f32 %v909_v13, %v1010_v38 }
 0x193   : > { %v475_v16 = vpop.xlane.xlu1 %474  ;;  %910 = vrcp.f32 %v478_v14 }
 0x194   : > { %912 = vrcp.f32 %v475_v16  ;;  %865 = vmatmul.msk.f32.vlgmr.msrb.gmra.mxu2 %vm281_vm0, %v494_v15 }
 0x199   : > { %v911_v17 = vpop.eup %910 }
 0x19a   : > { %v913_v18 = vpop.eup %912  ;;  %v460_v19 = vpop.xlane.xlu2 %459  ;;  %v496_v21 = vmul.f32 %v911_v17, %v895_v49 }
 0x19b   : > { %v466_v20 = vpop.xlane.xlu0 %465  ;;  %914 = vrcp.f32 %v460_v19  ;;  %v481_v22 = vpop.xlane.xlu1 %480  ;;  %v495_v23 = vmul.f32 %v913_v18, %v897_v52 }
 0x19c   : > { %916 = vrcp.f32 %v481_v22  ;;  %867 = vmatmul.msk.f32.vlgmr.msrb.gmra.mxu3 %vm281_vm0, %v496_v21 }
 0x19d   : > { %918 = vrcp.f32 %v466_v20  ;;  %866 = vmatmul.msk.f32.gmra.mxu2 %vm281_vm0, %v495_v23 }
 0x1a1   : > { %v915_v24 = vpop.eup %914 }
 0x1a2   : > { %v917_v25 = vpop.eup %916  ;;  %v463_v26 = vpop.xlane.xlu2 %462  ;;  %v490_v28 = vmul.f32 %v915_v24, %v903_v60 }
 0x1a3   : > { %v469_v27 = vpop.xlane.xlu0 %468  ;;  %v919_v29 = vpop.eup %918  ;;  %920 = vrcp.f32 %v463_v26  ;;  %v497_v30 = vmul.f32 %v917_v25, %v901_v59 }
 0x1a4   : > { %922 = vrcp.f32 %v469_v27  ;;  %861 = vmatmul.msk.f32.vlgmr.msrb.gmra.mxu0 %vm281_vm0, %v490_v28  ;;  %v492_v31 = vmul.f32 %v919_v29, %v1016_v57 }
 0x1a5   : > { %868 = vmatmul.msk.f32.gmra.mxu3 %vm281_vm0, %v497_v30 }
 0x1a6   : > { %863 = vmatmul.msk.f32.vlgmr.msrb.gmra.mxu1 %vm281_vm0, %v492_v31 }
 0x1a9   : > { %v921_v32 = vpop.eup %920 }
 0x1aa   : > { %v923_v33 = vpop.eup %922  ;;  %v491_v34 = vmul.f32 %v921_v32, %v905_v1 }
 0x1ab   : > { %v493_v35 = vmul.f32 %v923_v33, %v907_v2 }
 0x1ac   : > { %862 = vmatmul.msk.f32.gmra.mxu0 %vm281_vm0, %v491_v34 }
 0x1ae   : > { %864 = vmatmul.msk.f32.gmra.mxu1 %vm281_vm0, %v493_v35 }
 0x217   : > { %v579_v36 = vpop.f32.mrf.mxu2 }
 0x218   : > { %873 = vmatmul.msk.f32.vlgmr.msra.gmra.mxu2 %vm281_vm0, %v579_v36 }
 0x21f   : > { %v608_v37 = vpop.f32.mrf.mxu3 }
 0x220   : > { %v582_v38 = vpop.f32.mrf.mxu2  ;;  %875 = vmatmul.msk.f32.vlgmr.msra.gmra.mxu3 %vm281_vm0, %v608_v37 }
 0x221   : > { %874 = vmatmul.msk.f32.gmra.mxu2 %vm281_vm0, %v582_v38  ;;  %v521_v39 = vpop.f32.mrf.mxu0 }
 0x222   : > { %869 = vmatmul.msk.f32.vlgmr.msra.gmra.mxu0 %vm281_vm0, %v521_v39 }
 0x223   : > { %v550_v40 = vpop.f32.mrf.mxu1 }
 0x224   : > { %871 = vmatmul.msk.f32.vlgmr.msra.gmra.mxu1 %vm281_vm0, %v550_v40 }
 0x228   : > { %v611_v41 = vpop.f32.mrf.mxu3 }
 0x229   : > { %876 = vmatmul.msk.f32.gmra.mxu3 %vm281_vm0, %v611_v41  ;;  %v524_v42 = vpop.f32.mrf.mxu0 }
 0x22a   : > { %870 = vmatmul.msk.f32.gmra.mxu0 %vm281_vm0, %v524_v42 }
 0x22b   : > { %v553_v43 = vpop.f32.mrf.mxu1 }
 0x22c   : > { %872 = vmatmul.msk.f32.gmra.mxu1 %vm281_vm0, %v553_v43 }
 0x29b   : > { %v699_v44 = vpop.f32.mrf.mxu2 }
 0x29c   : > { %v738_v51 = vsel %vm734_vm1, %v699_v44, 0.0 }
 0x29f   : > { %v641_v45 = vpop.f32.mrf.mxu0 }
 0x2a0   : > { %v735_v46 = vsel %vm734_vm1, %v641_v45, 0.0 }
 0x2a1   : > { %v670_v47 = vpop.f32.mrf.mxu1 }
 0x2a2   : > { %v736_v48 = vsel %vm734_vm1, %v670_v47, 0.0 }
 0x2a3   : > { %v737_v49 = vadd.f32 %v736_v48, %v735_v46  ;;  %v728_v50 = vpop.f32.mrf.mxu3 }
 0x2a4   : > { %v740_v52 = vsel %vm734_vm1, %v728_v50, 0.0  ;;  %v702_v58 = vpop.f32.mrf.mxu2 }
 0x2a5   : > { %v739_v53 = vadd.f32 %v738_v51, %v737_v49  ;;  %v745_v63 = vsel %vm734_vm1, %v702_v58, 0.0 }
 0x2a7   : > { %v741_v55 = vadd.f32 %v740_v52, %v739_v53  ;;  %v644_v56 = vpop.f32.mrf.mxu0 }
 0x2a8   : > { %v742_v57 = vsel %vm734_vm1, %v644_v56, 0.0 }
 0x2a9   : > { %v753_v59 = vadd.f32 %v891_v54, %v741_v55  ;;  %v673_v60 = vpop.f32.mrf.mxu1 }
 0x2aa   : > { %v743_v61 = vsel %vm734_vm1, %v673_v60, 0.0 }
 0x2ab   : > { %755 = vst.msk [vmem:[%s264_s21] sm:$0xff] %vm734_vm1, %v753_v59  ;;  %v744_v62 = vadd.f32 %v743_v61, %v742_v57 }
 0x2ac   : > { %v731_v0 = vpop.f32.mrf.mxu3 }
 0x2ad   : > { %v746_v1 = vadd.f32 %v745_v63, %v744_v62  ;;  %v747_v2 = vsel %vm734_vm1, %v731_v0, 0.0 }
 0x2af   : > { %v748_v3 = vadd.f32 %v747_v2, %v746_v1 }
 0x2b1   : > { %v754_v4 = vadd.f32 %v891_v54, %v748_v3 }
 0x2b3   : > { %756 = vst.msk [vmem:[%s264_s21 + $0x8] sm:$0xff] %vm734_vm1, %v754_v4 }
 0x2b4 PF: > { %s15_s18 = sadd.s32 1, %s930_s18  }
 0x2b5   : > { %p12_p4 = scmp.ge.s32.totalorder %s15_s18, 4  }
 0x2b7   :  { %14 = sbr.rel (!%p12_p4) target bundleno = 1 (0x1), region = 76 }

// kernel: cross_attention_forward.11
= control target key start
LH: loop header
LB: loop body
LE: loop exit
PB: predicated region body
PF: predicated region fallthrough
CT: control target
= control target key end

     0   :  { %vm48_vm0 = vcmask 261120   ;;  %s769_s0 = inlined_call_operand.vmem [shape: f32[32,32], index: 0, kind: input, shape index: {}]   ;;  %s770_s1 = inlined_call_operand.vmem [shape: f32[32,32], index: 1, kind: input, shape index: {}]   ;;  %s771_s2 = inlined_call_operand.vmem [shape: f32[1,32], index: 2, kind: input, shape index: {}]   ;;  %s772_s3 = inlined_call_operand.vmem [shape: f32[1,32], index: 3, kind: input, shape index: {}]   ;;  %s773_s4 = inlined_call_operand.vmem [shape: f32[32,128], index: 4, kind: input, shape index: {}]   ;;  %s774_s5 = inlined_call_operand.vmem [shape: f32[1,128], index: 5, kind: input, shape index: {}]   ;;  %s775_s6 = inlined_call_operand.vmem [shape: f32[128,32], index: 6, kind: input, shape index: {}]   ;;  %s776_s7 = inlined_call_operand.vmem [shape: f32[1,32], index: 7, kind: input, shape index: {}]   ;;  %s777_s8 = inlined_call_operand.vmem [shape: f32[1,32], index: 8, kind: input, shape index: {}]   ;;  %s778_s9 = inlined_call_operand.vmem [shape: f32[1,32], index: 9, kind: input, shape index: {}]   ;;  %s779_s10 = inlined_call_operand.hbm [shape: f32[32,32], index: 10, kind: output, shape index: {}]  }
   0x1   :  { %v38_v0 = vld [vmem:[%s769_s0 + $0x10] sm:$0xff]  ;;  %v36_v2 = vld [vmem:[%s769_s0] sm:$0xff]  ;;  %v39_v5 = vld [vmem:[%s769_s0 + $0x18] sm:$0xff] }
   0x2   :  { %v42_v1 = vld [vmem:[%s770_s1 + $0x10] sm:$0xff]  ;;  %v40_v4 = vld [vmem:[%s770_s1] sm:$0xff]  ;;  %v43_v7 = vld [vmem:[%s770_s1 + $0x18] sm:$0xff] }
   0x3   :  { %v46_v3 = vadd.f32 %v42_v1, %v38_v0  ;;  %v44_v6 = vadd.f32 %v40_v4, %v36_v2  ;;  %v37_v8 = vld [vmem:[%s769_s0 + $0x8] sm:$0xff]  ;;  %v47_v12 = vadd.f32 %v43_v7, %v39_v5 }
   0x4   :  { %v41_v10 = vld [vmem:[%s770_s1 + $0x8] sm:$0xff] }
   0x5   :  { %v55_v9 = vsel %vm48_vm0, %v46_v3, 0.0  ;;  %v49_v11 = vsel %vm48_vm0, %v44_v6, 0.0 }
   0x6   :  { %56 = vadd.xlane.f32.xlu1 %v55_v9  ;;  %50 = vadd.xlane.f32.xlu0 %v49_v11 }
   0x7   :  { %15 = vsyncpa [#allocation3], 0  ;;  %v45_v13 = vadd.f32 %v41_v10, %v37_v8  ;;  %v58_v14 = vsel %vm48_vm0, %v47_v12, 0.0  ;;  %v482_v16 = vmov 32.0   ;;  %v163_v43 = vld [vmem:[%s773_s4 + $0x18] sm:$0xff]  ;;  %v162_v44 = vld [vmem:[%s773_s4 + $0x10] sm:$0xff] }
   0x8   :  { %438 = vrcp.f32 %v482_v16  ;;  %192 = vmatpush.msra.mxu0 %v163_v43  ;;  %v161_v45 = vld [vmem:[%s773_s4 + $0x8] sm:$0xff]  ;;  %v160_v46 = vld [vmem:[%s773_s4] sm:$0xff]  ;;  %v228_v10 = vld [vmem:[%s775_s6 + $0x78] sm:$0xff]  ;;  %s380_s1 = sshll.u32 %s779_s10, 4  ;;  %s484_s29 = smov 128   ;;  %s381_s1 = int_to_ptr.hbm [resolvable:$true] %s380_s1 }
   0x9   :  { %v52_v15 = vsel %vm48_vm0, %v45_v13, 0.0  ;;  %v625_v9 = vld [vmem:[%s771_s2] ss:$0 sm:$0xff]  ;;  %v227_v11 = vld [vmem:[%s775_s6 + $0x70] sm:$0xff]  ;;  %233 = vmatpush.msra.mxu1 %v228_v10  ;;  %396 = vmatpush.msra.mxu2 %v228_v10  ;;  %v226_v16 = vld [vmem:[%s775_s6 + $0x68] sm:$0xff]  ;;  %s485_s30 = smov 8  }
   0xa   :  { %193 = vmatpush.msra.mxu0 %v162_v44  ;;  %397 = vmatpush.msra.mxu3 %v228_v10 }
   0xb   :  { %234 = vmatpush.msra.mxu1 %v227_v11  ;;  %398 = vmatpush.msra.mxu2 %v227_v11 }
   0xc   :  { %194 = vmatpush.msra.mxu0 %v161_v45  ;;  %399 = vmatpush.msra.mxu3 %v227_v11 }
   0xd   :  { %235 = vmatpush.msra.mxu1 %v226_v16  ;;  %400 = vmatpush.msra.mxu2 %v226_v16 }
   0xe   :  { %59 = vadd.xlane.f32.xlu1 %v58_v14  ;;  %53 = vadd.xlane.f32.xlu0 %v52_v15  ;;  %v439_v17 = vpop.eup %438  ;;  %v637_v15 = vld [vmem:[%s772_s3] ss:$0 sm:$0xff] }
   0xf   :  { %v62_v18 = vmul.f32 32.0, %v439_v17  ;;  %vm66_vm1 = vweird.f32 %v439_v17  ;;  %195 = vmatpush.msra.mxu0 %v160_v46  ;;  %401 = vmatpush.msra.mxu3 %v226_v16  ;;  %v218_v46 = vld [vmem:[%s775_s6 + $0x28] sm:$0xff] }
  0x11   :  { %v63_v19 = vsub.f32 1.0, %v62_v18 }
  0x13   :  { %v64_v20 = vmul.f32 %v439_v17, %v63_v19 }
  0x15   :  { %v65_v21 = vadd.f32 %v439_v17, %v64_v20 }
  0x17   :  { %v569_v22 = vsel %vm66_vm1, %v439_v17, %v65_v21  ;;  %v225_v21 = vld [vmem:[%s775_s6 + $0x60] sm:$0xff] }
  0x18   :  { %236 = vmatpush.msra.mxu1 %v225_v21  ;;  %402 = vmatpush.msra.mxu2 %v225_v21 }
  0x19   :  { %403 = vmatpush.msra.mxu3 %v225_v21 }
  0x79   :  { %v57_v23 = vpop.xlane.xlu1 %56  ;;  %v51_v25 = vpop.xlane.xlu0 %50 }
  0x7a   :  { %v70_v24 = vmul.f32 %v569_v22, %v57_v23  ;;  %v68_v26 = vmul.f32 %v569_v22, %v51_v25  ;;  %v224_v25 = vld [vmem:[%s775_s6 + $0x58] sm:$0xff] }
  0x7b   :  { %237 = vmatpush.msra.mxu1 %v224_v25  ;;  %404 = vmatpush.msra.mxu2 %v224_v25 }
  0x7c   :  { %v573_v27 = vsub.f32 %v46_v3, %v70_v24  ;;  %v575_v28 = vsub.f32 %v44_v6, %v68_v26  ;;  %405 = vmatpush.msra.mxu3 %v224_v25 }
  0x7e   :  { %v78_v29 = vmul.f32 %v573_v27, %v573_v27  ;;  %v76_v30 = vmul.f32 %v575_v28, %v575_v28 }
  0x80   :  { %v86_v31 = vsel %vm48_vm0, %v78_v29, 0.0  ;;  %v80_v33 = vsel %vm48_vm0, %v76_v30, 0.0 }
  0x81   :  { %v60_v32 = vpop.xlane.xlu1 %59  ;;  %87 = vadd.xlane.f32.xlu0 %v86_v31  ;;  %81 = vadd.xlane.f32.xlu2 %v80_v33  ;;  %v54_v35 = vpop.xlane.xlu0 %53  ;;  %v223_v31 = vld [vmem:[%s775_s6 + $0x50] sm:$0xff] }
  0x82   :  { %v71_v34 = vmul.f32 %v569_v22, %v60_v32  ;;  %v69_v36 = vmul.f32 %v569_v22, %v54_v35  ;;  %238 = vmatpush.msra.mxu1 %v223_v31  ;;  %406 = vmatpush.msra.mxu2 %v223_v31 }
  0x83   :  { %407 = vmatpush.msra.mxu3 %v223_v31 }
  0x84   :  { %v585_v37 = vsub.f32 %v47_v12, %v71_v34  ;;  %v587_v38 = vsub.f32 %v45_v13, %v69_v36  ;;  %v222_v34 = vld [vmem:[%s775_s6 + $0x48] sm:$0xff] }
  0x85   :  { %239 = vmatpush.msra.mxu1 %v222_v34  ;;  %408 = vmatpush.msra.mxu2 %v222_v34 }
  0x86   :  { %v79_v39 = vmul.f32 %v585_v37, %v585_v37  ;;  %v77_v40 = vmul.f32 %v587_v38, %v587_v38  ;;  %409 = vmatpush.msra.mxu3 %v222_v34 }
  0x88   :  { %v89_v41 = vsel %vm48_vm0, %v79_v39, 0.0  ;;  %v83_v42 = vsel %vm48_vm0, %v77_v40, 0.0  ;;  %v221_v40 = vld [vmem:[%s775_s6 + $0x40] sm:$0xff] }
  0x89   :  { %90 = vadd.xlane.f32.xlu1 %v89_v41  ;;  %84 = vadd.xlane.f32.xlu2 %v83_v42  ;;  %v220_v42 = vld [vmem:[%s775_s6 + $0x38] sm:$0xff] }
  0x8a   :  { %240 = vmatpush.msra.mxu1 %v221_v40  ;;  %410 = vmatpush.msra.mxu2 %v221_v40 }
  0x8b   :  { %411 = vmatpush.msra.mxu3 %v221_v40 }
  0x8c   :  { %241 = vmatpush.msra.mxu1 %v220_v42  ;;  %412 = vmatpush.msra.mxu2 %v220_v42 }
  0x8d   :  { %413 = vmatpush.msra.mxu3 %v220_v42 }
  0xf4   :  { %v88_v47 = vpop.xlane.xlu0 %87  ;;  %v82_v48 = vpop.xlane.xlu2 %81 }
  0xf5   :  { %v94_v49 = vmul.f32 %v88_v47, %v569_v22  ;;  %v92_v50 = vmul.f32 %v82_v48, %v569_v22  ;;  %v217_v48 = vld [vmem:[%s775_s6 + $0x20] sm:$0xff] }
  0xf7   :  { %v98_v51 = vadd.f32 1e-05, %v94_v49  ;;  %v96_v52 = vadd.f32 1e-05, %v92_v50 }
  0xf9   :  { %440 = vrsqrt.f32 %v98_v51  ;;  %vm106_vm3 = vweird.f32 %v96_v52  ;;  %vm126_vm5 = vweird.f32 %v98_v51 }
  0xfa   :  { %442 = vrsqrt.f32 %v96_v52 }
  0xfc   :  { %v91_v53 = vpop.xlane.xlu1 %90  ;;  %v85_v55 = vpop.xlane.xlu2 %84 }
  0xfd   :  { %v95_v54 = vmul.f32 %v91_v53, %v569_v22  ;;  %v93_v56 = vmul.f32 %v85_v55, %v569_v22  ;;  %v213_v55 = vld [vmem:[%s775_s6] sm:$0xff] }
  0xff   :  { %v611_v57 = vpop.eup %440  ;;  %v613_v58 = vadd.f32 1e-05, %v95_v54  ;;  %v97_v60 = vadd.f32 1e-05, %v93_v56  ;;  %v214_v54 = vld [vmem:[%s775_s6 + $0x8] sm:$0xff] }
 0x100   :  { %v443_v59 = vpop.eup %442  ;;  %v121_v62 = vmul.f32 %v611_v57, %v98_v51  ;;  %vm127_vm6 = vweird.f32 %v611_v57  ;;  %v216_v51 = vld [vmem:[%s775_s6 + $0x18] sm:$0xff]  ;;  %v434_v56 = vld [vmem:[%s774_s5] ss:$0 sm:$0xff] }
 0x101   :  { %v101_v61 = vmul.f32 %v443_v59, %v96_v52  ;;  %444 = vrsqrt.f32 %v613_v58  ;;  %vm107_vm2 = vweird.f32 %v443_v59  ;;  %vm655_vm8 = vmor %vm126_vm5, %vm127_vm6  ;;  %vm116_vm9 = vweird.f32 %v97_v60 }
 0x102   :  { %446 = vrsqrt.f32 %v97_v60  ;;  %v122_v1 = vmul.f32 %v611_v57, %v121_v62  ;;  %vm108_vm4 = vmor %vm106_vm3, %vm107_vm2  ;;  %vm136_vm11 = vweird.f32 %v613_v58 }
 0x103   :  { %v102_v63 = vmul.f32 %v443_v59, %v101_v61 }
 0x104   :  { %v123_v6 = vmul.f32 0.5, %v122_v1 }
 0x105   :  { %v103_v0 = vmul.f32 0.5, %v102_v63 }
 0x106   :  { %v124_v17 = vsub.f32 1.5, %v123_v6 }
 0x107   :  { %v618_v2 = vpop.eup %444  ;;  %v104_v3 = vsub.f32 1.5, %v103_v0 }
 0x108   :  { %v447_v4 = vpop.eup %446  ;;  %v131_v7 = vmul.f32 %v618_v2, %v613_v58  ;;  %v125_v26 = vmul.f32 %v611_v57, %v124_v17  ;;  %vm137_vm12 = vweird.f32 %v618_v2 }
 0x109   :  { %v105_v5 = vmul.f32 %v443_v59, %v104_v3  ;;  %v111_v8 = vmul.f32 %v447_v4, %v97_v60  ;;  %vm117_vm7 = vweird.f32 %v447_v4  ;;  %vm685_vm13 = vmor %vm136_vm11, %vm137_vm12 }
 0x10a   :  { %v132_v18 = vmul.f32 %v618_v2, %v131_v7  ;;  %vm118_vm10 = vmor %vm116_vm9, %vm117_vm7  ;;  %v129_v35 = vsel %vm655_vm8, %v611_v57, %v125_v26 }
 0x10b   :  { %v109_v12 = vsel %vm108_vm4, %v443_v59, %v105_v5  ;;  %v112_v13 = vmul.f32 %v447_v4, %v111_v8  ;;  %v142_v41 = vmul.f32 %v129_v35, %v573_v27  ;;  %v219_v27 = vld [vmem:[%s775_s6 + $0x30] sm:$0xff]  ;;  %v435_v5 = vld [vmem:[%s776_s7] ss:$0 sm:$0xff] }
 0x10c   :  { %v140_v14 = vmul.f32 %v109_v12, %v575_v28  ;;  %v133_v29 = vmul.f32 0.5, %v132_v18  ;;  %242 = vmatpush.msra.mxu1 %v219_v27  ;;  %414 = vmatpush.msra.mxu2 %v219_v27 }
 0x10d   :  { %v113_v19 = vmul.f32 0.5, %v112_v13  ;;  %v150_v45 = vmul.f32 %v625_v9, %v142_v41  ;;  %415 = vmatpush.msra.mxu3 %v219_v27 }
 0x10e   :  { %v148_v20 = vmul.f32 %v625_v9, %v140_v14  ;;  %v134_v36 = vsub.f32 1.5, %v133_v29  ;;  %243 = vmatpush.msra.mxu1 %v218_v46  ;;  %416 = vmatpush.msra.mxu2 %v218_v46 }
 0x10f   :  { %v114_v23 = vsub.f32 1.5, %v113_v19  ;;  %v158_v49 = vadd.f32 %v637_v15, %v150_v45  ;;  %417 = vmatpush.msra.mxu3 %v218_v46 }
 0x110   :  { %v649_v24 = vadd.f32 %v637_v15, %v148_v20  ;;  %v135_v43 = vmul.f32 %v618_v2, %v134_v36  ;;  %244 = vmatpush.msra.mxu1 %v217_v48  ;;  %418 = vmatpush.msra.mxu2 %v217_v48 }
 0x111   :  { %v115_v30 = vmul.f32 %v447_v4, %v114_v23  ;;  %419 = vmatpush.msra.mxu3 %v217_v48 }
 0x112   :  { %392 = vmatmul.msk.f32.vlgmr.msra.gmra.mxu0 %vm48_vm0, %v649_v24  ;;  %v139_v47 = vsel %vm685_vm13, %v618_v2, %v135_v43  ;;  %245 = vmatpush.msra.mxu1 %v216_v51 }
 0x113   :  { %v119_v32 = vsel %vm118_vm10, %v447_v4, %v115_v30  ;;  %v143_v50 = vmul.f32 %v139_v47, %v585_v37  ;;  %420 = vmatpush.msra.mxu2 %v216_v51  ;;  %421 = vmatpush.msra.mxu3 %v216_v51  ;;  %v215_v37 = vld [vmem:[%s775_s6 + $0x10] sm:$0xff] }
 0x114   :  { %v141_v33 = vmul.f32 %v119_v32, %v587_v38  ;;  %246 = vmatpush.msra.mxu1 %v215_v37 }
 0x115   :  { %v151_v52 = vmul.f32 %v625_v9, %v143_v50  ;;  %422 = vmatpush.msra.mxu2 %v215_v37  ;;  %423 = vmatpush.msra.mxu3 %v215_v37 }
 0x116   :  { %v149_v39 = vmul.f32 %v625_v9, %v141_v33  ;;  %247 = vmatpush.msra.mxu1 %v214_v54 }
 0x117   :  { %v159_v53 = vadd.f32 %v637_v15, %v151_v52  ;;  %424 = vmatpush.msra.mxu2 %v214_v54  ;;  %425 = vmatpush.msra.mxu3 %v214_v54 }
 0x118   :  { %v678_v38 = vadd.f32 %v637_v15, %v149_v39  ;;  %248 = vmatpush.msra.mxu1 %v213_v55 }
 0x119   :  { %426 = vmatpush.msra.mxu2 %v213_v55  ;;  %427 = vmatpush.msra.mxu3 %v213_v55  ;;  %v436_v55 = vld [vmem:[%s777_s8] ss:$0 sm:$0xff]  ;;  %s483_s8 = smov [#allocation2]  }
 0x11a   :  { %393 = vmatmul.msk.f32.gmra.mxu0 %vm48_vm0, %v678_v38 }
 0x122   :  { %394 = vmatmul.msk.f32.gmra.mxu0 %vm48_vm0, %v158_v49 }
 0x12a   :  { %395 = vmatmul.msk.f32.gmra.mxu0 %vm48_vm0, %v159_v53 }
 0x18f   :  { %v197_v57 = vpop.f32.mrf.mxu0 }
 0x190   :  { %v198_v58 = vadd.f32 %v434_v56, %v197_v57 }
 0x192   :  { %v209_v59 = vmax.f32 %v198_v58, 0.0  ;;  %v437_v58 = vld [vmem:[%s778_s9] ss:$0 sm:$0xff]  ;;  %s378_s9 = sshll.u32 %s483_s8, 4  ;;  %s379_s9 = int_to_ptr.vmem [resolvable:$true] %s378_s9 }
 0x194   :  { %249 = vmatmul.f32.vlgmr.msra.gmra.mxu1 %v209_v59 }
 0x197   :  { %v200_v60 = vpop.f32.mrf.mxu0 }
 0x198   :  { %v201_v61 = vadd.f32 %v434_v56, %v200_v60 }
 0x19a   :  { %v210_v62 = vmax.f32 %v201_v61, 0.0 }
 0x19c   :  { %252 = vmatmul.f32.vlgmr.msra.gmra.mxu2 %v210_v62 }
 0x19f   :  { %v203_v63 = vpop.f32.mrf.mxu0 }
 0x1a0   :  { %v204_v0 = vadd.f32 %v434_v56, %v203_v63 }
 0x1a2   :  { %v211_v1 = vmax.f32 %v204_v0, 0.0 }
 0x1a4   :  { %255 = vmatmul.f32.vlgmr.msra.gmra.mxu3 %v211_v1 }
 0x1a7   :  { %v206_v2 = vpop.f32.mrf.mxu0 }
 0x1a8   :  { %v207_v3 = vadd.f32 %v434_v56, %v206_v2 }
 0x1aa   :  { %v212_v4 = vmax.f32 %v207_v3, 0.0 }
 0x1ac   :  { %258 = vmatmul.f32.gmra.mxu3 %v212_v4 }
 0x211   :  { %v250_v6 = vpop.f32.mrf.mxu1 }
 0x212   :  { %v251_v7 = vadd.f32 %v435_v5, %v250_v6 }
 0x214   :  { %v262_v8 = vadd.f32 %v251_v7, %v649_v24 }
 0x216   :  { %v266_v9 = vsel %vm48_vm0, %v262_v8, 0.0 }
 0x217   :  { %267 = vadd.xlane.f32.xlu2 %v266_v9 }
 0x21f   :  { %v253_v10 = vpop.f32.mrf.mxu2 }
 0x220   :  { %v254_v11 = vadd.f32 %v435_v5, %v253_v10 }
 0x222   :  { %v263_v12 = vadd.f32 %v254_v11, %v678_v38 }
 0x224   :  { %v269_v13 = vsel %vm48_vm0, %v263_v12, 0.0 }
 0x225   :  { %270 = vadd.xlane.f32.xlu0 %v269_v13 }
 0x227   :  { %v256_v14 = vpop.f32.mrf.mxu3 }
 0x228   :  { %v257_v15 = vadd.f32 %v435_v5, %v256_v14 }
 0x22a   :  { %v264_v16 = vadd.f32 %v257_v15, %v158_v49 }
 0x22c   :  { %v272_v17 = vsel %vm48_vm0, %v264_v16, 0.0 }
 0x22d   :  { %273 = vadd.xlane.f32.xlu1 %v272_v17 }
 0x22f   :  { %v259_v18 = vpop.f32.mrf.mxu3 }
 0x230   :  { %v260_v19 = vadd.f32 %v435_v5, %v259_v18 }
 0x232   :  { %v265_v20 = vadd.f32 %v260_v19, %v159_v53 }
 0x234   :  { %v275_v21 = vsel %vm48_vm0, %v265_v20, 0.0 }
 0x235   :  { %276 = vadd.xlane.f32.xlu2 %v275_v21 }
 0x28a   :  { %v268_v23 = vpop.xlane.xlu2 %267 }
 0x28b   :  { %v278_v24 = vmul.f32 %v268_v23, %v569_v22 }
 0x28d   :  { %v282_v25 = vsub.f32 %v262_v8, %v278_v24 }
 0x28f   :  { %v286_v26 = vmul.f32 %v282_v25, %v282_v25 }
 0x291   :  { %v290_v28 = vsel %vm48_vm0, %v286_v26, 0.0 }
 0x292   :  { %291 = vadd.xlane.f32.xlu0 %v290_v28 }
 0x298   :  { %v271_v29 = vpop.xlane.xlu0 %270 }
 0x299   :  { %v279_v30 = vmul.f32 %v271_v29, %v569_v22 }
 0x29b   :  { %v283_v31 = vsub.f32 %v263_v12, %v279_v30 }
 0x29d   :  { %v287_v32 = vmul.f32 %v283_v31, %v283_v31 }
 0x29f   :  { %v293_v33 = vsel %vm48_vm0, %v287_v32, 0.0 }
 0x2a0   :  { %v274_v34 = vpop.xlane.xlu1 %273  ;;  %294 = vadd.xlane.f32.xlu1 %v293_v33 }
 0x2a1   :  { %v280_v35 = vmul.f32 %v274_v34, %v569_v22 }
 0x2a3   :  { %v739_v36 = vsub.f32 %v264_v16, %v280_v35 }
 0x2a5   :  { %v288_v39 = vmul.f32 %v739_v36, %v739_v36 }
 0x2a7   :  { %v296_v40 = vsel %vm48_vm0, %v288_v39, 0.0 }
 0x2a8   :  { %v277_v38 = vpop.xlane.xlu2 %276  ;;  %297 = vadd.xlane.f32.xlu2 %v296_v40 }
 0x2a9   :  { %v281_v41 = vmul.f32 %v277_v38, %v569_v22 }
 0x2ab   :  { %v745_v42 = vsub.f32 %v265_v20, %v281_v41 }
 0x2ad   :  { %v289_v43 = vmul.f32 %v745_v42, %v745_v42 }
 0x2af   :  { %v299_v44 = vsel %vm48_vm0, %v289_v43, 0.0 }
 0x2b0   :  { %300 = vadd.xlane.f32.xlu0 %v299_v44 }
 0x305   :  { %v292_v27 = vpop.xlane.xlu0 %291 }
 0x306   :  { %v302_v45 = vmul.f32 %v292_v27, %v569_v22 }
 0x308   :  { %v306_v46 = vadd.f32 1e-05, %v302_v45 }
 0x30a   :  { %448 = vrsqrt.f32 %v306_v46  ;;  %vm316_vm15 = vweird.f32 %v306_v46 }
 0x310   :  { %v449_v47 = vpop.eup %448 }
 0x311   :  { %v311_v48 = vmul.f32 %v449_v47, %v306_v46  ;;  %vm317_vm14 = vweird.f32 %v449_v47 }
 0x312   :  { %vm318_vm1 = vmor %vm316_vm15, %vm317_vm14 }
 0x313   :  { %v312_v49 = vmul.f32 %v449_v47, %v311_v48  ;;  %v295_v50 = vpop.xlane.xlu1 %294 }
 0x314   :  { %v303_v51 = vmul.f32 %v295_v50, %v569_v22 }
 0x315   :  { %v313_v52 = vmul.f32 0.5, %v312_v49 }
 0x316   :  { %v307_v53 = vadd.f32 1e-05, %v303_v51 }
 0x317   :  { %v314_v37 = vsub.f32 1.5, %v313_v52 }
 0x318   :  { %450 = vrsqrt.f32 %v307_v53  ;;  %vm326_vm3 = vweird.f32 %v307_v53 }
 0x319   :  { %v315_v54 = vmul.f32 %v449_v47, %v314_v37 }
 0x31b   :  { %v319_v56 = vsel %vm318_vm1, %v449_v47, %v315_v54  ;;  %v298_v57 = vpop.xlane.xlu2 %297 }
 0x31c   :  { %v350_v59 = vmul.f32 %v319_v56, %v282_v25  ;;  %v304_v60 = vmul.f32 %v298_v57, %v569_v22 }
 0x31e   :  { %v451_v61 = vpop.eup %450  ;;  %v358_v62 = vmul.f32 %v436_v55, %v350_v59  ;;  %v308_v63 = vadd.f32 1e-05, %v304_v60 }
 0x31f   :  { %v321_v0 = vmul.f32 %v451_v61, %v307_v53  ;;  %vm327_vm2 = vweird.f32 %v451_v61 }
 0x320   :  { %v366_v1 = vadd.f32 %v437_v58, %v358_v62  ;;  %452 = vrsqrt.f32 %v308_v63  ;;  %vm328_vm4 = vmor %vm326_vm3, %vm327_vm2  ;;  %vm336_vm6 = vweird.f32 %v308_v63 }
 0x321   :  { %v322_v2 = vmul.f32 %v451_v61, %v321_v0 }
 0x322   :  { %370 = vst.msk [vmem:[#allocation2] sm:$0xff] %vm48_vm0, %v366_v1 }
 0x323   :  { %v323_v3 = vmul.f32 0.5, %v322_v2  ;;  %v301_v4 = vpop.xlane.xlu0 %300 }
 0x324   :  { %v305_v5 = vmul.f32 %v301_v4, %v569_v22 }
 0x325   :  { %v324_v6 = vsub.f32 1.5, %v323_v3 }
 0x326   :  { %v453_v7 = vpop.eup %452  ;;  %v309_v8 = vadd.f32 1e-05, %v305_v5 }
 0x327   :  { %v325_v9 = vmul.f32 %v451_v61, %v324_v6  ;;  %v331_v10 = vmul.f32 %v453_v7, %v308_v63  ;;  %vm337_vm5 = vweird.f32 %v453_v7 }
 0x328   :  { %454 = vrsqrt.f32 %v309_v8  ;;  %vm338_vm7 = vmor %vm336_vm6, %vm337_vm5  ;;  %vm346_vm9 = vweird.f32 %v309_v8 }
 0x329   :  { %v329_v11 = vsel %vm328_vm4, %v451_v61, %v325_v9  ;;  %v332_v12 = vmul.f32 %v453_v7, %v331_v10 }
 0x32a   :  { %v351_v13 = vmul.f32 %v329_v11, %v283_v31 }
 0x32b   :  { %v333_v14 = vmul.f32 0.5, %v332_v12 }
 0x32c   :  { %v359_v15 = vmul.f32 %v436_v55, %v351_v13 }
 0x32d   :  { %v334_v16 = vsub.f32 1.5, %v333_v14 }
 0x32e   :  { %v455_v17 = vpop.eup %454  ;;  %v367_v18 = vadd.f32 %v437_v58, %v359_v15 }
 0x32f   :  { %v335_v19 = vmul.f32 %v453_v7, %v334_v16  ;;  %v341_v22 = vmul.f32 %v455_v17, %v309_v8  ;;  %vm347_vm8 = vweird.f32 %v455_v17 }
 0x330   :  { %371 = vst.msk [vmem:[#allocation2 + $0x8] sm:$0xff] %vm48_vm0, %v367_v18  ;;  %vm348_vm10 = vmor %vm346_vm9, %vm347_vm8 }
 0x331   :  { %v339_v20 = vsel %vm338_vm7, %v453_v7, %v335_v19  ;;  %v342_v21 = vmul.f32 %v455_v17, %v341_v22 }
 0x332   :  { %v352_v23 = vmul.f32 %v339_v20, %v739_v36 }
 0x333   :  { %v343_v24 = vmul.f32 0.5, %v342_v21 }
 0x334   :  { %v360_v25 = vmul.f32 %v436_v55, %v352_v23 }
 0x335   :  { %v344_v26 = vsub.f32 1.5, %v343_v24 }
 0x336   :  { %v368_v28 = vadd.f32 %v437_v58, %v360_v25 }
 0x337   :  { %v345_v29 = vmul.f32 %v455_v17, %v344_v26 }
 0x338   :  { %372 = vst.msk [vmem:[#allocation2 + $0x10] sm:$0xff] %vm48_vm0, %v368_v28 }
 0x339   :  { %v349_v30 = vsel %vm348_vm10, %v455_v17, %v345_v29 }
 0x33a   :  { %v353_v31 = vmul.f32 %v349_v30, %v745_v42 }
 0x33c   :  { %v361_v32 = vmul.f32 %v436_v55, %v353_v31 }
 0x33e   :  { %v369_v33 = vadd.f32 %v437_v58, %v361_v32 }
 0x340   :  { %373 = vst.msk [vmem:[#allocation2 + $0x18] sm:$0xff] %vm48_vm0, %v369_v33 }
 0x341   :  { %386 = dma.vmem_to_hbm [thread:$0]  %s379_s9, 512, %s381_s1, [#allocation3], %s484_s29, %s484_s29, %s485_s30  }
 0x342   :  { %480 = dma.done.wait [#allocation3], 512  }
 0x343   :  { %481 = vsyncadd [#allocation3], 4294966784 }
 0x344   :  { %391 = vsyncpa [#allocation3], 1 }

// kernel: cross_attention_forward.8
= control target key start
LH: loop header
LB: loop body
LE: loop exit
PB: predicated region body
PF: predicated region fallthrough
CT: control target
= control target key end

     0   :  { %s824_s18 = smov 0   ;;  %s899_s0 = inlined_call_operand.vmem [shape: f32[2,4,8,8], index: 0, kind: input, shape index: {}]   ;;  %s900_s1 = inlined_call_operand.vmem [shape: f32[2,4,16,8], index: 1, kind: input, shape index: {}]   ;;  %s901_s2 = inlined_call_operand.vmem [shape: f32[2,4,16,8], index: 2, kind: input, shape index: {}]   ;;  %s902_s3 = inlined_call_operand.vmem [shape: f32[4,8,32], index: 3, kind: input, shape index: {}]   ;;  %s903_s4 = inlined_call_operand.vmem [shape: f32[1,32], index: 4, kind: input, shape index: {}]   ;;  %s904_s5 = inlined_call_operand.vmem [shape: f32[2,8,32], index: 5, kind: output, shape index: {}]  }
   0x1 LB: > { %s724_s19 = sadd.s32 4294967295, %s792_s18   ;;  %p728_p0 = scmp.ge.s32.totalorder %s792_s18, 1  ;;  %s792_s18 = sphi %s824_s18, %s15_s18  }
   0x2   : > { %p207_p1 = scmp.lt.s32.totalorder %s792_s18, 3 }
   0x4   : > { %p208_p2 = pnand %p728_p0, %p207_p1 }
   0x5   : > { %p244_p3 = scmp.lt.s32.totalorder (!%p208_p2), %s724_s19, 1 }
   0x6   : > { %211 = sbr.rel (%p208_p2) target bundleno = 687 (0x2af), region = 40 }
   0xb   : > { %s906_s19 = smov (!%p244_p3, %s724_s19), 1  ;;  %vm283_vm0 = vcmask 64512   ;;  %vm400_vm1 = vcmask 130048   ;;  %v537_v60 = vld [vmem:[%s902_s3] sm:$0xff]  ;;  %v538_v61 = vld [vmem:[%s902_s3 + $0x8] sm:$0xff]  ;;  %v539_v62 = vld [vmem:[%s902_s3 + $0x10] sm:$0xff] }
   0xc   : > { %s759_s20 = sshll.u32 %s906_s19, 6  ;;  %s758_s24 = sshll.u32 %s906_s19, 5  ;;  %v540_v63 = vld [vmem:[%s902_s3 + $0x18] sm:$0xff]  ;;  %vm633_vm2 = vcmask 261120  }
   0xd   : > { %s253_s23 = scalar_lea.vmem %s900_s1, %s759_s20  ;;  %s248_s27 = scalar_lea.vmem %s899_s0, %s758_s24 }
   0xe   : > { %v268_v0 = vld [vmem:[%s253_s23 + $0x8] sm:$0xff]  ;;  %v267_v2 = vld [vmem:[%s253_s23] sm:$0xff]  ;;  %v270_v4 = vld [vmem:[%s253_s23 + $0x18] sm:$0xff]  ;;  %s258_s30 = scalar_lea.vmem %s901_s2, %s759_s20  ;;  %s735_s14 = sshll.u32 %s906_s19, 3 }
   0xf   : > { %v272_v1 = vld [vmem:[%s253_s23 + $0x28] sm:$0xff]  ;;  %736 = vmatpush.xpose.msk.msra.mxu0 %vm283_vm0, %v268_v0  ;;  %v271_v3 = vld [vmem:[%s253_s23 + $0x20] sm:$0xff]  ;;  %v274_v5 = vld [vmem:[%s253_s23 + $0x38] sm:$0xff]  ;;  %739 = vmatpush.xpose.msk.msra.mxu1 %vm283_vm0, %v270_v4  ;;  %s262_s21 = scalar_lea.vmem %s904_s5, %s735_s14 }
  0x10   : > { %742 = vmatpush.xpose.msk.msra.mxu2 %vm283_vm0, %v272_v1  ;;  %745 = vmatpush.xpose.msk.msra.mxu3 %vm283_vm0, %v274_v5  ;;  %v269_v6 = vld [vmem:[%s253_s23 + $0x10] sm:$0xff]  ;;  %v263_v8 = vld [vmem:[%s248_s27] sm:$0xff]  ;;  %v264_v10 = vld [vmem:[%s248_s27 + $0x8] sm:$0xff] }
  0x11   : > { %v273_v7 = vld [vmem:[%s253_s23 + $0x30] sm:$0xff]  ;;  %v266_v11 = vld [vmem:[%s248_s27 + $0x18] sm:$0xff]  ;;  %v276_v40 = vld [vmem:[%s258_s30 + $0x8] sm:$0xff] }
  0x12   : > { %v265_v9 = vld [vmem:[%s248_s27 + $0x10] sm:$0xff]  ;;  %v275_v41 = vld [vmem:[%s258_s30] sm:$0xff]  ;;  %v280_v42 = vld [vmem:[%s258_s30 + $0x28] sm:$0xff] }
  0x13   : > { %737 = vmatpush.xpose.msk.msra.mxu0 %vm283_vm0, %v267_v2  ;;  %740 = vmatpush.xpose.msk.msra.mxu1 %vm283_vm0, %v269_v6  ;;  %v278_v43 = vld [vmem:[%s258_s30 + $0x18] sm:$0xff]  ;;  %v279_v44 = vld [vmem:[%s258_s30 + $0x20] sm:$0xff]  ;;  %v277_v45 = vld [vmem:[%s258_s30 + $0x10] sm:$0xff] }
  0x14   : > { %743 = vmatpush.xpose.msk.msra.mxu2 %vm283_vm0, %v271_v3  ;;  %746 = vmatpush.xpose.msk.msra.mxu3 %vm283_vm0, %v273_v7  ;;  %v282_v46 = vld [vmem:[%s258_s30 + $0x38] sm:$0xff]  ;;  %v281_v47 = vld [vmem:[%s258_s30 + $0x30] sm:$0xff] }
  0x16   : > { %738 = vmatmul.msk.f32.vlgmr.msra.gmra.mxu0 %vm283_vm0, %v263_v8  ;;  %741 = vmatmul.msk.f32.vlgmr.msra.gmra.mxu1 %vm283_vm0, %v264_v10 }
  0x17   : > { %744 = vmatmul.msk.f32.vlgmr.msra.gmra.mxu2 %vm283_vm0, %v265_v9  ;;  %747 = vmatmul.msk.f32.vlgmr.msra.gmra.mxu3 %vm283_vm0, %v266_v11 }
  0x18   : > { %462 = vmatpush.msrb.mxu0 %v276_v40  ;;  %508 = vmatpush.msrb.mxu2 %v280_v42 }
  0x19   : > { %485 = vmatpush.msrb.mxu1 %v278_v43  ;;  %531 = vmatpush.msrb.mxu3 %v282_v46 }
  0x1a   : > { %463 = vmatpush.msrb.mxu0 %v275_v41  ;;  %509 = vmatpush.msrb.mxu2 %v279_v44 }
  0x1b   : > { %486 = vmatpush.msrb.mxu1 %v277_v45  ;;  %532 = vmatpush.msrb.mxu3 %v281_v47 }
  0x1c   : > { %559 = vmatpush.msra.mxu0 %v537_v60  ;;  %605 = vmatpush.msra.mxu2 %v539_v62 }
  0x1d   : > { %582 = vmatpush.msra.mxu1 %v538_v61  ;;  %628 = vmatpush.msra.mxu3 %v540_v63 }
  0x93   : > { %v310_v12 = vpop.f32.mrf.mxu0  ;;  %v339_v14 = vpop.f32.mrf.mxu1 }
  0x94   : > { %v401_v13 = vsel %vm400_vm1, %v310_v12, -inf  ;;  %v404_v17 = vsel %vm400_vm1, %v339_v14, -inf }
  0x95   : > { %402 = vmax.xlane.f32.xlu1 %v401_v13  ;;  %v769_v13 = vld [vmem:[%s903_s4] ss:$0 sm:$0xff] }
  0x9a   : > { %v368_v15 = vpop.f32.mrf.mxu2  ;;  %v397_v18 = vpop.f32.mrf.mxu3 }
  0x9b   : > { %v407_v16 = vsel %vm400_vm1, %v368_v15, -inf  ;;  %v410_v19 = vsel %vm400_vm1, %v397_v18, -inf }
  0x9c   : > { %408 = vmax.xlane.f32.xlu0 %v407_v16 }
  0x9d   : > { %405 = vmax.xlane.f32.xlu1 %v404_v17 }
  0xa4   : > { %411 = vmax.xlane.f32.xlu0 %v410_v19 }
 0x108   : > { %v403_v20 = vpop.xlane.xlu1 %402 }
 0x109   : > { %v413_v21 = vsub.f32 %v310_v12, %v403_v20 }
 0x10b   : > { %v417_v22 = vmul.f32 1.442695, %v413_v21 }
 0x10d   : > { %770 = vpow2.f32 %v417_v22 }
 0x10f   : > { %v409_v23 = vpop.xlane.xlu0 %408 }
 0x110   : > { %v415_v24 = vsub.f32 %v368_v15, %v409_v23  ;;  %v406_v25 = vpop.xlane.xlu1 %405 }
 0x111   : > { %v414_v27 = vsub.f32 %v339_v14, %v406_v25 }
 0x112   : > { %v421_v26 = vmul.f32 1.442695, %v415_v24 }
 0x113   : > { %v771_v28 = vpop.eup %770  ;;  %v419_v29 = vmul.f32 1.442695, %v414_v27 }
 0x114   : > { %772 = vpow2.f32 %v421_v26  ;;  %v425_v30 = vsel %vm400_vm1, %v771_v28, 0.0 }
 0x115   : > { %774 = vpow2.f32 %v419_v29  ;;  %426 = vadd.xlane.f32.xlu0 %v425_v30 }
 0x117   : > { %v412_v31 = vpop.xlane.xlu0 %411 }
 0x118   : > { %v416_v32 = vsub.f32 %v397_v18, %v412_v31 }
 0x11a   : > { %v773_v33 = vpop.eup %772  ;;  %v423_v34 = vmul.f32 1.442695, %v416_v32 }
 0x11b   : > { %v431_v35 = vsel %vm400_vm1, %v773_v33, 0.0  ;;  %v775_v36 = vpop.eup %774 }
 0x11c   : > { %776 = vpow2.f32 %v423_v34  ;;  %432 = vadd.xlane.f32.xlu2 %v431_v35  ;;  %v428_v37 = vsel %vm400_vm1, %v775_v36, 0.0 }
 0x11d   : > { %429 = vadd.xlane.f32.xlu1 %v428_v37 }
 0x122   : > { %v777_v38 = vpop.eup %776 }
 0x123   : > { %v434_v39 = vsel %vm400_vm1, %v777_v38, 0.0 }
 0x124   : > { %435 = vadd.xlane.f32.xlu2 %v434_v39 }
 0x188   : > { %v427_v48 = vpop.xlane.xlu0 %426 }
 0x189   : > { %778 = vrcp.f32 %v427_v48 }
 0x18f   : > { %v433_v49 = vpop.xlane.xlu2 %432  ;;  %v779_v50 = vpop.eup %778 }
 0x190   : > { %780 = vrcp.f32 %v433_v49  ;;  %v441_v51 = vmul.f32 %v779_v50, %v771_v28  ;;  %v430_v52 = vpop.xlane.xlu1 %429 }
 0x191   : > { %782 = vrcp.f32 %v430_v52 }
 0x192   : > { %748 = vmatmul.msk.f32.vlgmr.msrb.gmra.mxu0 %vm400_vm1, %v441_v51 }
 0x196   : > { %v781_v53 = vpop.eup %780 }
 0x197   : > { %v436_v54 = vpop.xlane.xlu2 %435  ;;  %v443_v55 = vmul.f32 %v781_v53, %v773_v33  ;;  %v783_v56 = vpop.eup %782 }
 0x198   : > { %784 = vrcp.f32 %v436_v54  ;;  %v442_v57 = vmul.f32 %v783_v56, %v775_v36 }
 0x199   : > { %750 = vmatmul.msk.f32.vlgmr.msrb.gmra.mxu2 %vm400_vm1, %v443_v55 }
 0x19a   : > { %749 = vmatmul.msk.f32.vlgmr.msrb.gmra.mxu1 %vm400_vm1, %v442_v57 }
 0x19e   : > { %v785_v58 = vpop.eup %784 }
 0x19f   : > { %v444_v59 = vmul.f32 %v785_v58, %v777_v38 }
 0x1a1   : > { %751 = vmatmul.msk.f32.vlgmr.msrb.gmra.mxu3 %vm400_vm1, %v444_v59 }
 0x20f   : > { %v465_v0 = vpop.f32.mrf.mxu0 }
 0x210   : > { %752 = vmatmul.msk.f32.vlgmr.msra.gmra.mxu0 %vm283_vm0, %v465_v0 }
 0x217   : > { %v488_v1 = vpop.f32.mrf.mxu1 }
 0x218   : > { %753 = vmatmul.msk.f32.vlgmr.msra.gmra.mxu1 %vm283_vm0, %v488_v1 }
 0x21c   : > { %v511_v2 = vpop.f32.mrf.mxu2 }
 0x21d   : > { %754 = vmatmul.msk.f32.vlgmr.msra.gmra.mxu2 %vm283_vm0, %v511_v2 }
 0x224   : > { %v534_v3 = vpop.f32.mrf.mxu3 }
 0x225   : > { %755 = vmatmul.msk.f32.vlgmr.msra.gmra.mxu3 %vm283_vm0, %v534_v3 }
 0x28d   : > { %v561_v5 = vpop.f32.mrf.mxu0 }
 0x28e   : > { %v634_v8 = vsel %vm633_vm2, %v561_v5, 0.0 }
 0x295   : > { %v584_v4 = vpop.f32.mrf.mxu1 }
 0x296   : > { %v635_v7 = vsel %vm633_vm2, %v584_v4, 0.0 }
 0x297   : > { %v636_v10 = vadd.f32 %v635_v7, %v634_v8 }
 0x2a0   : > { %v607_v6 = vpop.f32.mrf.mxu2 }
 0x2a1   : > { %v637_v9 = vsel %vm633_vm2, %v607_v6, 0.0 }
 0x2a2   : > { %v638_v11 = vadd.f32 %v637_v9, %v636_v10 }
 0x2a8   : > { %v630_v12 = vpop.f32.mrf.mxu3 }
 0x2a9   : > { %v639_v14 = vsel %vm633_vm2, %v630_v12, 0.0 }
 0x2aa   : > { %v640_v15 = vadd.f32 %v639_v14, %v638_v11 }
 0x2ac   : > { %v645_v16 = vadd.f32 %v769_v13, %v640_v15 }
 0x2ae   : > { %646 = vst.msk [vmem:[%s262_s21] sm:$0xff] %vm633_vm2, %v645_v16 }
 0x2af PF: > { %s15_s18 = sadd.s32 1, %s792_s18  }
 0x2b0   : > { %p12_p4 = scmp.ge.s32.totalorder %s15_s18, 4  }
 0x2b2   :  { %14 = sbr.rel (!%p12_p4) target bundleno = 1 (0x1), region = 76 }

// kernel: cross_attention_forward.10
= control target key start
LH: loop header
LB: loop body
LE: loop exit
PB: predicated region body
PF: predicated region fallthrough
CT: control target
= control target key end

     0   :  { %vm42_vm0 = vcmask 261120   ;;  %s514_s0 = inlined_call_operand.vmem [shape: f32[16,32], index: 0, kind: input, shape index: {}]   ;;  %s515_s1 = inlined_call_operand.vmem [shape: f32[16,32], index: 1, kind: input, shape index: {}]   ;;  %s516_s2 = inlined_call_operand.vmem [shape: f32[1,32], index: 2, kind: input, shape index: {}]   ;;  %s517_s3 = inlined_call_operand.vmem [shape: f32[1,32], index: 3, kind: input, shape index: {}]   ;;  %s518_s4 = inlined_call_operand.vmem [shape: f32[32,128], index: 4, kind: input, shape index: {}]   ;;  %s519_s5 = inlined_call_operand.vmem [shape: f32[1,128], index: 5, kind: input, shape index: {}]   ;;  %s520_s6 = inlined_call_operand.vmem [shape: f32[128,32], index: 6, kind: input, shape index: {}]   ;;  %s521_s7 = inlined_call_operand.vmem [shape: f32[1,32], index: 7, kind: input, shape index: {}]   ;;  %s522_s8 = inlined_call_operand.vmem [shape: f32[1,32], index: 8, kind: input, shape index: {}]   ;;  %s523_s9 = inlined_call_operand.vmem [shape: f32[1,32], index: 9, kind: input, shape index: {}]   ;;  %s524_s10 = inlined_call_operand.hbm [shape: f32[16,32], index: 10, kind: output, shape index: {}]  }
   0x1   :  { %v36_v0 = vld [vmem:[%s514_s0] sm:$0xff]  ;;  %v37_v2 = vld [vmem:[%s514_s0 + $0x8] sm:$0xff] }
   0x2   :  { %v38_v1 = vld [vmem:[%s515_s1] sm:$0xff]  ;;  %v39_v4 = vld [vmem:[%s515_s1 + $0x8] sm:$0xff] }
   0x3   :  { %v40_v3 = vadd.f32 %v38_v1, %v36_v0 }
   0x5   :  { %v43_v5 = vsel %vm42_vm0, %v40_v3, 0.0 }
   0x6   :  { %15 = vsyncpa [#allocation3], 0  ;;  %44 = vadd.xlane.f32.xlu0 %v43_v5  ;;  %v41_v6 = vadd.f32 %v39_v4, %v37_v2  ;;  %v330_v8 = vmov 32.0   ;;  %v109_v25 = vld [vmem:[%s518_s4 + $0x18] sm:$0xff]  ;;  %v108_v26 = vld [vmem:[%s518_s4 + $0x10] sm:$0xff]  ;;  %s332_s23 = smov 128  }
   0x7   :  { %294 = vrcp.f32 %v330_v8  ;;  %132 = vmatpush.msra.mxu0 %v109_v25  ;;  %v107_v27 = vld [vmem:[%s518_s4 + $0x8] sm:$0xff]  ;;  %v106_v28 = vld [vmem:[%s518_s4] sm:$0xff]  ;;  %v160_v32 = vld [vmem:[%s520_s6 + $0x78] sm:$0xff]  ;;  %s333_s24 = smov 8  }
   0x8   :  { %v46_v7 = vsel %vm42_vm0, %v41_v6, 0.0  ;;  %v159_v33 = vld [vmem:[%s520_s6 + $0x70] sm:$0xff]  ;;  %165 = vmatpush.msra.mxu1 %v160_v32  ;;  %268 = vmatpush.msra.mxu2 %v160_v32  ;;  %v158_v34 = vld [vmem:[%s520_s6 + $0x68] sm:$0xff]  ;;  %v157_v37 = vld [vmem:[%s520_s6 + $0x60] sm:$0xff] }
   0x9   :  { %133 = vmatpush.msra.mxu0 %v108_v26  ;;  %v156_v40 = vld [vmem:[%s520_s6 + $0x58] sm:$0xff]  ;;  %v155_v42 = vld [vmem:[%s520_s6 + $0x50] sm:$0xff]  ;;  %v154_v44 = vld [vmem:[%s520_s6 + $0x48] sm:$0xff] }
   0xa   :  { %166 = vmatpush.msra.mxu1 %v159_v33  ;;  %269 = vmatpush.msra.mxu2 %v159_v33  ;;  %v153_v46 = vld [vmem:[%s520_s6 + $0x40] sm:$0xff]  ;;  %v152_v49 = vld [vmem:[%s520_s6 + $0x38] sm:$0xff]  ;;  %v151_v53 = vld [vmem:[%s520_s6 + $0x30] sm:$0xff] }
   0xb   :  { %134 = vmatpush.msra.mxu0 %v107_v27  ;;  %v288_v52 = vld [vmem:[%s516_s2] ss:$0 sm:$0xff]  ;;  %v150_v58 = vld [vmem:[%s520_s6 + $0x28] sm:$0xff]  ;;  %v148_v0 = vld [vmem:[%s520_s6 + $0x18] sm:$0xff] }
   0xc   :  { %167 = vmatpush.msra.mxu1 %v158_v34  ;;  %270 = vmatpush.msra.mxu2 %v158_v34  ;;  %v289_v57 = vld [vmem:[%s517_s3] ss:$0 sm:$0xff] }
   0xd   :  { %v295_v9 = vpop.eup %294  ;;  %135 = vmatpush.msra.mxu0 %v106_v28  ;;  %v149_v61 = vld [vmem:[%s520_s6 + $0x20] sm:$0xff] }
   0xe   :  { %47 = vadd.xlane.f32.xlu0 %v46_v7  ;;  %v50_v10 = vmul.f32 32.0, %v295_v9  ;;  %vm54_vm1 = vweird.f32 %v295_v9  ;;  %168 = vmatpush.msra.mxu1 %v157_v37  ;;  %v146_v7 = vld [vmem:[%s520_s6 + $0x8] sm:$0xff]  ;;  %v145_v8 = vld [vmem:[%s520_s6] sm:$0xff] }
   0xf   :  { %271 = vmatpush.msra.mxu2 %v157_v37 }
  0x10   :  { %v51_v11 = vsub.f32 1.0, %v50_v10  ;;  %169 = vmatpush.msra.mxu1 %v156_v40 }
  0x11   :  { %272 = vmatpush.msra.mxu2 %v156_v40 }
  0x12   :  { %v52_v12 = vmul.f32 %v295_v9, %v51_v11  ;;  %170 = vmatpush.msra.mxu1 %v155_v42 }
  0x13   :  { %273 = vmatpush.msra.mxu2 %v155_v42 }
  0x14   :  { %v53_v13 = vadd.f32 %v295_v9, %v52_v12  ;;  %171 = vmatpush.msra.mxu1 %v154_v44 }
  0x15   :  { %274 = vmatpush.msra.mxu2 %v154_v44 }
  0x16   :  { %v403_v14 = vsel %vm54_vm1, %v295_v9, %v53_v13  ;;  %172 = vmatpush.msra.mxu1 %v153_v46  ;;  %v290_v9 = vld [vmem:[%s519_s5] ss:$0 sm:$0xff] }
  0x17   :  { %275 = vmatpush.msra.mxu2 %v153_v46 }
  0x18   :  { %173 = vmatpush.msra.mxu1 %v152_v49 }
  0x19   :  { %276 = vmatpush.msra.mxu2 %v152_v49 }
  0x1a   :  { %174 = vmatpush.msra.mxu1 %v151_v53 }
  0x1b   :  { %277 = vmatpush.msra.mxu2 %v151_v53 }
  0x1c   :  { %175 = vmatpush.msra.mxu1 %v150_v58 }
  0x1d   :  { %278 = vmatpush.msra.mxu2 %v150_v58 }
  0x1e   :  { %176 = vmatpush.msra.mxu1 %v149_v61 }
  0x1f   :  { %279 = vmatpush.msra.mxu2 %v149_v61 }
  0x20   :  { %177 = vmatpush.msra.mxu1 %v148_v0 }
  0x21   :  { %280 = vmatpush.msra.mxu2 %v148_v0 }
  0x79   :  { %v45_v15 = vpop.xlane.xlu0 %44 }
  0x7a   :  { %v56_v16 = vmul.f32 %v403_v14, %v45_v15 }
  0x7c   :  { %v406_v17 = vsub.f32 %v40_v3, %v56_v16 }
  0x7e   :  { %v60_v18 = vmul.f32 %v406_v17, %v406_v17 }
  0x80   :  { %v62_v19 = vsel %vm42_vm0, %v60_v18, 0.0 }
  0x81   :  { %63 = vadd.xlane.f32.xlu1 %v62_v19  ;;  %v48_v20 = vpop.xlane.xlu0 %47 }
  0x82   :  { %v57_v21 = vmul.f32 %v403_v14, %v48_v20 }
  0x84   :  { %v412_v22 = vsub.f32 %v41_v6, %v57_v21  ;;  %v147_v6 = vld [vmem:[%s520_s6 + $0x10] sm:$0xff] }
  0x85   :  { %178 = vmatpush.msra.mxu1 %v147_v6  ;;  %281 = vmatpush.msra.mxu2 %v147_v6 }
  0x86   :  { %v61_v23 = vmul.f32 %v412_v22, %v412_v22 }
  0x87   :  { %179 = vmatpush.msra.mxu1 %v146_v7  ;;  %282 = vmatpush.msra.mxu2 %v146_v7 }
  0x88   :  { %v65_v24 = vsel %vm42_vm0, %v61_v23, 0.0 }
  0x89   :  { %66 = vadd.xlane.f32.xlu1 %v65_v24  ;;  %180 = vmatpush.msra.mxu1 %v145_v8 }
  0x8a   :  { %283 = vmatpush.msra.mxu2 %v145_v8 }
  0xf4   :  { %v64_v29 = vpop.xlane.xlu1 %63 }
  0xf5   :  { %v68_v30 = vmul.f32 %v64_v29, %v403_v14 }
  0xf7   :  { %v70_v31 = vadd.f32 1e-05, %v68_v30 }
  0xf9   :  { %296 = vrsqrt.f32 %v70_v31  ;;  %vm78_vm3 = vweird.f32 %v70_v31 }
  0xfc   :  { %v67_v35 = vpop.xlane.xlu1 %66 }
  0xfd   :  { %v69_v36 = vmul.f32 %v67_v35, %v403_v14 }
  0xff   :  { %v297_v38 = vpop.eup %296  ;;  %v71_v39 = vadd.f32 1e-05, %v69_v36 }
 0x100   :  { %v73_v41 = vmul.f32 %v297_v38, %v70_v31  ;;  %vm79_vm2 = vweird.f32 %v297_v38 }
 0x101   :  { %298 = vrsqrt.f32 %v71_v39  ;;  %vm80_vm4 = vmor %vm78_vm3, %vm79_vm2  ;;  %vm88_vm6 = vweird.f32 %v71_v39 }
 0x102   :  { %v74_v43 = vmul.f32 %v297_v38, %v73_v41 }
 0x104   :  { %v75_v45 = vmul.f32 0.5, %v74_v43 }
 0x106   :  { %v76_v47 = vsub.f32 1.5, %v75_v45 }
 0x107   :  { %v299_v48 = vpop.eup %298 }
 0x108   :  { %v77_v50 = vmul.f32 %v297_v38, %v76_v47  ;;  %v83_v51 = vmul.f32 %v299_v48, %v71_v39  ;;  %vm89_vm5 = vweird.f32 %v299_v48 }
 0x109   :  { %vm90_vm7 = vmor %vm88_vm6, %vm89_vm5 }
 0x10a   :  { %v81_v54 = vsel %vm80_vm4, %v297_v38, %v77_v50  ;;  %v84_v55 = vmul.f32 %v299_v48, %v83_v51  ;;  %v293_v51 = vld [vmem:[%s523_s9] ss:$0 sm:$0xff]  ;;  %s254_s9 = sshll.u32 %s524_s10, 4  ;;  %s255_s9 = int_to_ptr.hbm [resolvable:$true] %s254_s9 }
 0x10b   :  { %v92_v56 = vmul.f32 %v81_v54, %v406_v17  ;;  %v291_v17 = vld [vmem:[%s521_s7] ss:$0 sm:$0xff] }
 0x10c   :  { %v85_v59 = vmul.f32 0.5, %v84_v55 }
 0x10d   :  { %v98_v60 = vmul.f32 %v288_v52, %v92_v56 }
 0x10e   :  { %v86_v62 = vsub.f32 1.5, %v85_v59 }
 0x10f   :  { %v104_v63 = vadd.f32 %v289_v57, %v98_v60 }
 0x110   :  { %v87_v1 = vmul.f32 %v299_v48, %v86_v62 }
 0x111   :  { %266 = vmatmul.msk.f32.vlgmr.msra.gmra.mxu0 %vm42_vm0, %v104_v63 }
 0x112   :  { %v91_v2 = vsel %vm90_vm7, %v299_v48, %v87_v1  ;;  %v292_v48 = vld [vmem:[%s522_s8] ss:$0 sm:$0xff]  ;;  %s331_s8 = smov [#allocation2]  }
 0x113   :  { %v93_v3 = vmul.f32 %v91_v2, %v412_v22  ;;  %s252_s1 = sshll.u32 %s331_s8, 4  ;;  %s253_s1 = int_to_ptr.vmem [resolvable:$true] %s252_s1 }
 0x115   :  { %v99_v4 = vmul.f32 %v288_v52, %v93_v3 }
 0x117   :  { %v105_v5 = vadd.f32 %v289_v57, %v99_v4 }
 0x119   :  { %267 = vmatmul.msk.f32.gmra.mxu0 %vm42_vm0, %v105_v5 }
 0x18e   :  { %v137_v10 = vpop.f32.mrf.mxu0 }
 0x18f   :  { %v138_v11 = vadd.f32 %v290_v9, %v137_v10 }
 0x191   :  { %v143_v12 = vmax.f32 %v138_v11, 0.0 }
 0x193   :  { %181 = vmatmul.f32.vlgmr.msra.gmra.mxu1 %v143_v12 }
 0x196   :  { %v140_v13 = vpop.f32.mrf.mxu0 }
 0x197   :  { %v141_v15 = vadd.f32 %v290_v9, %v140_v13 }
 0x199   :  { %v144_v16 = vmax.f32 %v141_v15, 0.0 }
 0x19b   :  { %184 = vmatmul.f32.vlgmr.msra.gmra.mxu2 %v144_v16 }
 0x210   :  { %v182_v18 = vpop.f32.mrf.mxu1 }
 0x211   :  { %v183_v19 = vadd.f32 %v291_v17, %v182_v18 }
 0x213   :  { %v188_v20 = vadd.f32 %v183_v19, %v104_v63 }
 0x215   :  { %v190_v21 = vsel %vm42_vm0, %v188_v20, 0.0 }
 0x216   :  { %191 = vadd.xlane.f32.xlu2 %v190_v21 }
 0x21e   :  { %v185_v22 = vpop.f32.mrf.mxu2 }
 0x21f   :  { %v186_v23 = vadd.f32 %v291_v17, %v185_v22 }
 0x221   :  { %v189_v24 = vadd.f32 %v186_v23, %v105_v5 }
 0x223   :  { %v193_v25 = vsel %vm42_vm0, %v189_v24, 0.0 }
 0x224   :  { %194 = vadd.xlane.f32.xlu2 %v193_v25 }
 0x289   :  { %v192_v26 = vpop.xlane.xlu2 %191 }
 0x28a   :  { %v196_v27 = vmul.f32 %v192_v26, %v403_v14 }
 0x28c   :  { %v198_v28 = vsub.f32 %v188_v20, %v196_v27 }
 0x28e   :  { %v200_v29 = vmul.f32 %v198_v28, %v198_v28 }
 0x290   :  { %v202_v30 = vsel %vm42_vm0, %v200_v29, 0.0 }
 0x291   :  { %203 = vadd.xlane.f32.xlu0 %v202_v30 }
 0x297   :  { %v195_v31 = vpop.xlane.xlu2 %194 }
 0x298   :  { %v197_v32 = vmul.f32 %v195_v31, %v403_v14 }
 0x29a   :  { %v199_v33 = vsub.f32 %v189_v24, %v197_v32 }
 0x29c   :  { %v201_v34 = vmul.f32 %v199_v33, %v199_v33 }
 0x29e   :  { %v205_v35 = vsel %vm42_vm0, %v201_v34, 0.0 }
 0x29f   :  { %206 = vadd.xlane.f32.xlu1 %v205_v35 }
 0x304   :  { %v204_v36 = vpop.xlane.xlu0 %203 }
 0x305   :  { %v208_v37 = vmul.f32 %v204_v36, %v403_v14 }
 0x307   :  { %v210_v38 = vadd.f32 1e-05, %v208_v37 }
 0x309   :  { %300 = vrsqrt.f32 %v210_v38  ;;  %vm218_vm9 = vweird.f32 %v210_v38 }
 0x30f   :  { %v301_v39 = vpop.eup %300 }
 0x310   :  { %v213_v40 = vmul.f32 %v301_v39, %v210_v38  ;;  %vm219_vm8 = vweird.f32 %v301_v39 }
 0x311   :  { %vm220_vm10 = vmor %vm218_vm9, %vm219_vm8 }
 0x312   :  { %v214_v41 = vmul.f32 %v301_v39, %v213_v40  ;;  %v207_v42 = vpop.xlane.xlu1 %206 }
 0x313   :  { %v209_v43 = vmul.f32 %v207_v42, %v403_v14 }
 0x314   :  { %v215_v44 = vmul.f32 0.5, %v214_v41 }
 0x315   :  { %v211_v45 = vadd.f32 1e-05, %v209_v43 }
 0x316   :  { %v216_v46 = vsub.f32 1.5, %v215_v44 }
 0x317   :  { %302 = vrsqrt.f32 %v211_v45  ;;  %vm228_vm12 = vweird.f32 %v211_v45 }
 0x318   :  { %v217_v47 = vmul.f32 %v301_v39, %v216_v46 }
 0x31a   :  { %v221_v49 = vsel %vm220_vm10, %v301_v39, %v217_v47 }
 0x31b   :  { %v232_v50 = vmul.f32 %v221_v49, %v198_v28 }
 0x31d   :  { %v303_v52 = vpop.eup %302  ;;  %v238_v14 = vmul.f32 %v292_v48, %v232_v50 }
 0x31e   :  { %v223_v53 = vmul.f32 %v303_v52, %v211_v45  ;;  %vm229_vm11 = vweird.f32 %v303_v52 }
 0x31f   :  { %v244_v54 = vadd.f32 %v293_v51, %v238_v14  ;;  %vm230_vm13 = vmor %vm228_vm12, %vm229_vm11 }
 0x320   :  { %v224_v55 = vmul.f32 %v303_v52, %v223_v53 }
 0x321   :  { %246 = vst.msk [vmem:[#allocation2] sm:$0xff] %vm42_vm0, %v244_v54 }
 0x322   :  { %v225_v56 = vmul.f32 0.5, %v224_v55 }
 0x324   :  { %v226_v57 = vsub.f32 1.5, %v225_v56 }
 0x326   :  { %v227_v58 = vmul.f32 %v303_v52, %v226_v57 }
 0x328   :  { %v231_v59 = vsel %vm230_vm13, %v303_v52, %v227_v58 }
 0x329   :  { %v233_v60 = vmul.f32 %v231_v59, %v199_v33 }
 0x32b   :  { %v239_v61 = vmul.f32 %v292_v48, %v233_v60 }
 0x32d   :  { %v245_v62 = vadd.f32 %v293_v51, %v239_v61 }
 0x32f   :  { %247 = vst.msk [vmem:[#allocation2 + $0x8] sm:$0xff] %vm42_vm0, %v245_v62 }
 0x330   :  { %260 = dma.vmem_to_hbm [thread:$0]  %s253_s1, 256, %s255_s9, [#allocation3], %s332_s23, %s332_s23, %s333_s24  }
 0x331   :  { %328 = dma.done.wait [#allocation3], 256  }
 0x332   :  { %329 = vsyncadd [#allocation3], 4294967040 }
 0x333   :  { %265 = vsyncpa [#allocation3], 1 }

</bundles_post_ra>
